<compile_context>
chip_gen: v5e
topology: v5e:2x2
jax: 0.10.0
libtpu: 0.0.40
codegen_flags: <defaults>
</compile_context>

<pallas_src>
import jax
import jax.numpy as jnp
from jax.experimental import pallas as pl
from jax.experimental.pallas import tpu as pltpu

BF16 = jnp.bfloat16
F32 = jnp.float32


def _round_up(x, m):
    return (x + m - 1) // m * m


# ----------------------------- fused block kernel ----------------------------

def _build_block_kernel(H, W, stride, has_ds, sk_cfg):
    """Fused Bottleneck (+ optional trailing SKConv) over one batch element.

    Activations are flat (rows, channels).  The zero padding for the 3x3 convs is
    built inside VMEM scratch.  For stride == 2 only the even output rows are
    produced (still stride-1 in x); the wrapper drops odd columns afterwards.
    """
    assert stride in (1, 2)
    if sk_cfg is not None:
        assert stride == 1
    wp = W + 2
    Ho = H // stride

    def kernel(*refs):
        it = iter(refs)
        x_ref = next(it)
        w1, b1 = next(it), next(it)
        w2, b2 = next(it), next(it)
        w3, b3 = next(it), next(it)
        wd = bd = None
        if has_ds:
            wd, bd = next(it), next(it)
        wsk = bsk = None
        if sk_cfg is not None:
            wsk, bsk = next(it), next(it)
        o_ref = next(it)
        pad1 = next(it)
        pad2 = next(it) if sk_cfg is not None else None

        P = w2.shape[-1]
        x = x_ref[...]

        # ---- conv1 (1x1) + BN + ReLU ----------------------------------------
        h1 = jnp.dot(x, w1[...], preferred_element_type=F32) + b1[...]
        h1 = jnp.maximum(h1, 0.0)

        # ---- conv2 (3x3, pad 1, stride) + BN + ReLU (padding lives in VMEM) --
        pad1[...] = jnp.zeros(pad1.shape, pad1.dtype)
        for y in range(H):
            pad1[(y + 1) * wp + 1:(y + 1) * wp + 1 + W, :] = h1[y * W:(y + 1) * W, :]

        if stride == 1:
            M = H * wp
            acc = jnp.zeros((M, P), F32)
            for dy in range(3):
                for dx in range(3):
                    s0 = dy * wp + dx
                    tap = pad1[s0:s0 + M, :].astype(BF16)
                    acc = acc + jnp.dot(tap, w2[dy * 3 + dx],
                                        preferred_element_type=F32)
            acc = jnp.maximum(acc + b2[...], 0.0).astype(BF16)
            h2 = jnp.concatenate([acc[y * wp:y * wp + W] for y in range(H)], axis=0)
        else:
            rows = []
            for yo in range(Ho):
                y = stride * yo
                acc = jnp.zeros((W, P), F32)
                for dy in range(3):
                    for dx in range(3):
                        s0 = (y + dy) * wp + dx
                        tap = pad1[s0:s0 + W, :].astype(BF16)
                        acc = acc + jnp.dot(tap, w2[dy * 3 + dx],
                                            preferred_element_type=F32)
                rows.append(jnp.maximum(acc + b2[...], 0.0).astype(BF16))
            h2 = jnp.concatenate(rows, axis=0)        # (Ho*W, P): stride-1 in x

        # ---- conv3 (1x1) + BN + residual + ReLU ------------------------------
        out = jnp.dot(h2, w3[...], preferred_element_type=F32) + b3[...]
        if has_ds:
            if stride == 1:
                xs = x
            else:  # even image rows only (columns are subsampled in the wrapper)
                xs = jnp.concatenate([x[stride * yo * W:(stride * yo + 1) * W]
                                      for yo in range(Ho)], axis=0)
            iden = jnp.dot(xs, wd[...], preferred_element_type=F32) + bd[...]
        else:
            iden = x.astype(F32)
        out = jnp.maximum(out + iden, 0.0)

        if sk_cfg is None:
            o_ref[...] = out.astype(o_ref.dtype)
            return

        # ---- SKConv (M=1): grouped 3x3 conv + BN + ReLU; attention == 1 ------
        chunk, nch = sk_cfg
        pad2[...] = jnp.zeros(pad2.shape, pad2.dtype)
        for y in range(H):
            pad2[(y + 1) * wp + 1:(y + 1) * wp + 1 + W, :] = out[y * W:(y + 1) * W, :]
        M = H * wp
        outs = []
        for c in range(nch):
            acc = jnp.zeros((M, chunk), F32)
            for dy in range(3):
                for dx in range(3):
                    s0 = dy * wp + dx
                    tap = pad2[s0:s0 + M, c * chunk:(c + 1) * chunk].astype(BF16)
                    acc = acc + jnp.dot(tap, wsk[(dy * 3 + dx) * nch + c],
                                        preferred_element_type=F32)
            acc = jnp.maximum(acc + bsk[:, c * chunk:(c + 1) * chunk], 0.0).astype(BF16)
            outs.append(jnp.concatenate([acc[y * wp:y * wp + W] for y in range(H)],
                                        axis=0))
        sk_out = outs[0] if nch == 1 else jnp.concatenate(outs, axis=1)
        o_ref[...] = sk_out.astype(o_ref.dtype)

    return kernel


def block_forward(x, p, H, W):
    """x: (B, H*W, Cin) bf16 flat activation. Returns (y, Ho, Wo)."""
    B, _, Cin = x.shape
    stride = p["stride"]
    Ho, Wo = H // stride, W // stride
    P = p["w2"].shape[-1]
    Cout = p["w3"].shape[-1]
    has_ds = "wd" in p
    sk = p.get("sk")
    sk_cfg = None if sk is None else (sk["chunk"], sk["nch"])

    kernel = _build_block_kernel(H, W, stride, has_ds, sk_cfg)

    operands = [x, p["w1"], p["b1"], p["w2"], p["b2"], p["w3"], p["b3"]]
    in_specs = [
        pl.BlockSpec((None, H * W, Cin), lambda b: (b, 0, 0)),
        pl.BlockSpec((Cin, P), lambda b: (0, 0)),
        pl.BlockSpec((1, P), lambda b: (0, 0)),
        pl.BlockSpec((9, P, P), lambda b: (0, 0, 0)),
        pl.BlockSpec((1, P), lambda b: (0, 0)),
        pl.BlockSpec((P, Cout), lambda b: (0, 0)),
        pl.BlockSpec((1, Cout), lambda b: (0, 0)),
    ]
    if has_ds:
        operands += [p["wd"], p["bd"]]
        in_specs += [pl.BlockSpec((Cin, Cout), lambda b: (0, 0)),
                     pl.BlockSpec((1, Cout), lambda b: (0, 0))]
    if sk is not None:
        operands += [sk["w"], sk["b"]]
        in_specs += [pl.BlockSpec((9 * sk["nch"], sk["chunk"], sk["chunk"]),
                                  lambda b: (0, 0, 0)),
                     pl.BlockSpec((1, Cout), lambda b: (0, 0))]

    out_rows = H * W if stride == 1 else Ho * W
    scratch = [pltpu.VMEM((_round_up((H + 4) * (W + 2), 8), P), F32)]
    if sk is not None:
        scratch.append(pltpu.VMEM((_round_up((H + 4) * (W + 2), 8), Cout), F32))

    y = pl.pallas_call(
        kernel,
        grid=(B,),
        in_specs=in_specs,
        out_specs=pl.BlockSpec((None, out_rows, Cout), lambda b: (b, 0, 0)),
        out_shape=jax.ShapeDtypeStruct((B, out_rows, Cout), BF16),
        scratch_shapes=scratch,
        compiler_params=pltpu.CompilerParams(dimension_semantics=("parallel",)),
    )(*operands)

    if stride != 1:
        # drop the odd columns kept for contiguous lane-dense in-kernel stores
        y = y.reshape(B, Ho, W, Cout)[:, :, ::stride, :].reshape(B, Ho * Wo, Cout)
    return y, Ho, Wo


# ------------------------------- fused stem -----------------------------------

def _build_stem_kernel(Ho, Wo, Cs, chunk, nch):
    wp = Wo + 2
    Hp = Ho // 2

    def kernel(p_ref, ws, bs, wsk, bsk, x0_ref, x1_ref, pad_ref, pool_ref):
        # 7x7/s2 conv (im2col matmul) + BN + ReLU
        h = jnp.dot(p_ref[...], ws[...], preferred_element_type=F32) + bs[...]
        h = jnp.maximum(h, 0.0)                                    # (Ho*Wo, Cs) f32

        # SKConv (M=1 -> attention == 1): grouped 3x3 conv + BN + ReLU
        pad_ref[...] = jnp.zeros(pad_ref.shape, pad_ref.dtype)
        for y in range(Ho):
            pad_ref[(y + 1) * wp + 1:(y + 1) * wp + 1 + Wo, :] = h[y * Wo:(y + 1) * Wo, :]
        M = Ho * wp
        outs = []
        for c in range(nch):
            acc = jnp.zeros((M, chunk), F32)
            for dy in range(3):
                for dx in range(3):
                    s0 = dy * wp + dx
                    tap = pad_ref[s0:s0 + M, c * chunk:(c + 1) * chunk].astype(BF16)
                    acc = acc + jnp.dot(tap, wsk[(dy * 3 + dx) * nch + c],
                                        preferred_element_type=F32)
            outs.append(jnp.maximum(acc + bsk[:, c * chunk:(c + 1) * chunk], 0.0))
        v = outs[0] if nch == 1 else jnp.concatenate(outs, axis=1)  # (M, Cs) f32
        x0 = jnp.concatenate([v[y * wp:y * wp + Wo] for y in range(Ho)], axis=0)
        x0_ref[...] = x0.astype(x0_ref.dtype)

        # MaxPool2d(3, stride=2, pad=1): even rows here, even columns in wrapper
        neg = float(jnp.finfo(jnp.float32).min)
        pool_ref[...] = jnp.full(pool_ref.shape, neg, pool_ref.dtype)
        for y in range(Ho):
            pool_ref[(y + 1) * wp + 1:(y + 1) * wp + 1 + Wo, :] = x0[y * Wo:(y + 1) * Wo, :]
        prows = []
        for yo in range(Hp):
            r = None
            for dy in range(3):
                for dx in range(3):
                    s0 = (2 * yo + dy) * wp + dx
                    tap = pool_ref[s0:s0 + Wo, :]
                    r = tap if r is None else jnp.maximum(r, tap)
            prows.append(r)
        x1_ref[...] = jnp.concatenate(prows, axis=0).astype(x1_ref.dtype)

    return kernel


def stem_forward(params, x_nhwc):
    """Fused 7x7/s2 conv + BN + ReLU + SKConv + 3x3/s2 maxpool (one pallas_call)."""
    B, H, W, _ = x_nhwc.shape
    Ho, Wo = H // 2, W // 2
    Hp, Wp = Ho // 2, Wo // 2
    Cs = params["stem_w"].shape[-1]
    sk = params["init_sk"]
    chunk, nch = sk["chunk"], sk["nch"]

    # tiny im2col for the 7x7/s2 stem conv only (Cin = 3 -> negligible traffic)
    xp = jnp.pad(x_nhwc, ((0, 0), (3, 3), (3, 3), (0, 0)))
    cols = []
    for dy in range(7):
        for dx in range(7):
            cols.append(jax.lax.slice(
                xp, (0, dy, dx, 0),
                (B, dy + 2 * (Ho - 1) + 1, dx + 2 * (Wo - 1) + 1, 3),
                (1, 2, 2, 1)))
    patches = jnp.concatenate(cols, axis=-1).reshape(B, Ho * Wo, 49 * 3)

    kernel = _build_stem_kernel(Ho, Wo, Cs, chunk, nch)
    pad_rows = _round_up((Ho + 4) * (Wo + 2), 8)

    x0, x1w = pl.pallas_call(
        kernel,
        grid=(B,),
        in_specs=[
            pl.BlockSpec((None, Ho * Wo, 49 * 3), lambda b: (b, 0, 0)),
            pl.BlockSpec((49 * 3, Cs), lambda b: (0, 0)),
            pl.BlockSpec((1, Cs), lambda b: (0, 0)),
            pl.BlockSpec((9 * nch, chunk, chunk), lambda b: (0, 0, 0)),
            pl.BlockSpec((1, Cs), lambda b: (0, 0)),
        ],
        out_specs=(
            pl.BlockSpec((None, Ho * Wo, Cs), lambda b: (b, 0, 0)),
            pl.BlockSpec((None, Hp * Wo, Cs), lambda b: (b, 0, 0)),
        ),
        out_shape=(
            jax.ShapeDtypeStruct((B, Ho * Wo, Cs), BF16),
            jax.ShapeDtypeStruct((B, Hp * Wo, Cs), BF16),
        ),
        scratch_shapes=[pltpu.VMEM((pad_rows, Cs), F32),
                        pltpu.VMEM((pad_rows, Cs), F32)],
        compiler_params=pltpu.CompilerParams(dimension_semantics=("parallel",)),
    )(patches, params["stem_w"], params["stem_b"], sk["w"], sk["b"])

    x1 = x1w.reshape(B, Hp, Wo, Cs)[:, :, ::2, :].reshape(B, Hp * Wp, Cs)
    return x0, x1, Ho, Wo


# --------------------------- parameter construction ---------------------------

class _Init:
    """Deterministic synthetic parameters (no torchvision checkpoint load)."""

    def __init__(self, seed=0):
        self._key = jax.random.PRNGKey(seed)

    def key(self):
        self._key, k = jax.random.split(self._key)
        return k

    def conv(self, k, cin, cout):
        w = jax.random.normal(self.key(), (k, k, cin, cout), F32)
        return w / jnp.sqrt(float(k * k * cin))

    def bn(self, c):
        gamma = 1.0 + 0.1 * jax.random.normal(self.key(), (c,), F32)
        beta = 0.1 * jax.random.normal(self.key(), (c,), F32)
        mean = 0.1 * jax.random.normal(self.key(), (c,), F32)
        var = jax.random.uniform(self.key(), (c,), F32, minval=0.5, maxval=1.5)
        scale = gamma / jnp.sqrt(var + 1e-5)
        bias = beta - mean * scale
        return scale, bias

    def conv_bn(self, k, cin, cout):
        """Conv weight with inference-mode BN scale folded into output channels."""
        w = self.conv(k, cin, cout)
        scale, bias = self.bn(cout)
        return w * scale[None, None, None, :], bias

    def group_conv(self, k, c, groups):
        cg = c // groups
        w = jax.random.normal(self.key(), (k, k, groups, cg, cg), F32)
        w = w / jnp.sqrt(float(k * k * cg))
        b = 0.1 * jax.random.normal(self.key(), (c,), F32)
        return w, b


def make_skconv(init, c, groups=16):
    """SKConv(features=c, M=1, G=16): grouped 3x3 conv + BN + ReLU.
    With M=1 the softmax over the length-1 branch axis is exactly 1, so the fc/fcs
    attention branch is a mathematical no-op and is omitted.  The per-group weight
    is packed as lane-aligned block-diagonal chunks of width min(c, 128)."""
    cg = c // groups
    w_pg, conv_bias = init.group_conv(3, c, groups)        # (3,3,G,cg,cg), (c,)
    scale, bn_bias = init.bn(c)
    bias = bn_bias + conv_bias * scale                      # conv bias folded through BN
    w_pg = w_pg * scale.reshape(groups, cg)[None, None, :, None, :]
    chunk = min(c, 128)
    nch = c // chunk
    gpc = chunk // cg
    wc = jnp.zeros((3, 3, nch, chunk, chunk), F32)
    for ci in range(nch):
        for g0 in range(gpc):
            g = ci * gpc + g0
            wc = wc.at[:, :, ci, g0 * cg:(g0 + 1) * cg, g0 * cg:(g0 + 1) * cg].set(
                w_pg[:, :, g])
    return dict(chunk=chunk, nch=nch,
                w=wc.reshape(9 * nch, chunk, chunk).astype(BF16),
                b=bias.reshape(1, c))


def make_bottleneck(init, cin, planes, stride, with_sk):
    cout = planes * 4
    w1, b1 = init.conv_bn(1, cin, planes)
    w2, b2 = init.conv_bn(3, planes, planes)
    w3, b3 = init.conv_bn(1, planes, cout)
    p = dict(
        stride=stride, sk=None,
        w1=w1.reshape(cin, planes).astype(BF16), b1=b1.reshape(1, planes),
        w2=w2.reshape(9, planes, planes).astype(BF16), b2=b2.reshape(1, planes),
        w3=w3.reshape(planes, cout).astype(BF16), b3=b3.reshape(1, cout),
    )
    if stride != 1 or cin != cout:
        wd, bd = init.conv_bn(1, cin, cout)
        p["wd"] = wd.reshape(cin, cout).astype(BF16)
        p["bd"] = bd.reshape(1, cout)
    if with_sk:
        p["sk"] = make_skconv(init, cout)
    return p


def make_layer(init, cin, planes, blocks, stride):
    layer = [make_bottleneck(init, cin, planes, stride, with_sk=False)]
    cin = planes * 4
    for _ in range(1, blocks):
        layer.append(make_bottleneck(init, cin, planes, 1, with_sk=True))
    return layer, cin


def make_resnet50_encoder(base_channels=16, seed=0):
    assert base_channels % 16 == 0, "SKConv uses G=16 groups"
    init = _Init(seed)
    params = {}
    w0, b0 = init.conv_bn(7, 3, base_channels)
    params["stem_w"] = w0.reshape(49 * 3, base_channels).astype(BF16)
    params["stem_b"] = b0.reshape(1, base_channels)
    params["init_sk"] = make_skconv(init, base_channels)
    cin = base_channels
    params["layer1"], cin = make_layer(init, cin, base_channels, 3, 1)
    params["layer2"], cin = make_layer(init, cin, base_channels * 2, 4, 2)
    params["layer3"], cin = make_layer(init, cin, base_channels * 4, 6, 2)
    params["layer4"], cin = make_layer(init, cin, base_channels * 8, 3, 2)
    return params


def resnet50_encoder_forward(params, x_nchw):
    """Input NCHW f32 (PyTorch convention) -> (x0, x2, x3, x4, x5) as NCHW f32."""
    x = jnp.transpose(x_nchw, (0, 2, 3, 1)).astype(BF16)
    x0, x1, H0, W0 = stem_forward(params, x)
    H, W = H0 // 2, W0 // 2
    h = x1
    feats = []
    for name in ("layer1", "layer2", "layer3", "layer4"):
        for p in params[name]:
            h, H, W = block_forward(h, p, H, W)
        feats.append((h, H, W))

    def to_nchw(a, hh, ww):
        b, _, c = a.shape
        return jnp.transpose(a.reshape(b, hh, ww, c), (0, 3, 1, 2)).astype(F32)

    return tuple([to_nchw(x0, H0, W0)] + [to_nchw(a, hh, ww) for a, hh, ww in feats])


# ---------------------------------- self checks -------------------------------

def _ref_conv2d(x, w_hwio, stride=1, pad=1):
    return jax.lax.conv_general_dilated(
        x, w_hwio, (stride, stride), ((pad, pad), (pad, pad)),
        dimension_numbers=("NHWC", "HWIO", "NHWC"),
        precision=jax.lax.Precision.HIGHEST)


def _sk_dense_hwio(sk):
    chunk, nch = sk["chunk"], sk["nch"]
    C = chunk * nch
    w = sk["w"].astype(F32).reshape(9, nch, chunk, chunk)
    dense = jnp.zeros((9, C, C), F32)
    for c in range(nch):
        dense = dense.at[:, c * chunk:(c + 1) * chunk,
                         c * chunk:(c + 1) * chunk].set(w[:, c])
    return dense.reshape(3, 3, C, C)


def _ref_sk(x_bhwc_bf16, sk):
    y = _ref_conv2d(x_bhwc_bf16.astype(F32), _sk_dense_hwio(sk)) + sk["b"][0]
    return jnp.maximum(y, 0.0)


def _ref_block(x_bhwc, p):
    hp = jax.lax.Precision.HIGHEST
    f = lambda a: a.astype(F32)
    stride = p["stride"]
    P = p["w2"].shape[-1]
    h1 = jnp.maximum(jnp.einsum("bhwc,cp->bhwp", f(x_bhwc), f(p["w1"]), precision=hp)
                     + p["b1"][0], 0.0).astype(BF16)
    h2 = jnp.maximum(_ref_conv2d(f(h1), f(p["w2"]).reshape(3, 3, P, P), stride=stride)
                     + p["b2"][0], 0.0).astype(BF16)
    out = jnp.einsum("bhwp,pc->bhwc", f(h2), f(p["w3"]), precision=hp) + p["b3"][0]
    if "wd" in p:
        xs = x_bhwc[:, ::stride, ::stride, :]
        iden = jnp.einsum("bhwc,cd->bhwd", f(xs), f(p["wd"]), precision=hp) + p["bd"][0]
    else:
        iden = f(x_bhwc)
    out = jnp.maximum(out + iden, 0.0)
    if p["sk"] is not None:
        out = _ref_sk(out.astype(BF16), p["sk"])
    return out


def _check_block(init, key, H, W, cin, planes, stride, with_sk):
    p = make_bottleneck(init, cin, planes, stride, with_sk)
    x = jax.random.normal(key, (2, H * W, cin), F32).astype(BF16)
    got, Ho, Wo = block_forward(x, p, H, W)
    got = got.astype(F32).reshape(2, Ho, Wo, -1)
    want = _ref_block(x.reshape(2, H, W, cin), p)
    assert jnp.allclose(got, want, atol=5e-2, rtol=5e-2), (
        "fused block mismatch", float(jnp.max(jnp.abs(got - want))))


def _check_stem(init, key):
    bc = 16
    w0, b0 = init.conv_bn(7, 3, bc)
    params = dict(stem_w=w0.reshape(49 * 3, bc).astype(BF16),
                  stem_b=b0.reshape(1, bc),
                  init_sk=make_skconv(init, bc))
    x = jax.random.normal(key, (2, 16, 16, 3), F32).astype(BF16)
    x0, x1, Ho, Wo = stem_forward(params, x)
    g0 = x0.astype(F32).reshape(2, Ho, Wo, bc)
    g1 = x1.astype(F32).reshape(2, Ho // 2, Wo // 2, bc)
    w7 = params["stem_w"].astype(F32).reshape(7, 7, 3, bc)
    h = jnp.maximum(_ref_conv2d(x.astype(F32), w7, stride=2, pad=3)
                    + params["stem_b"][0], 0.0)
    r0 = _ref_sk(h.astype(BF16), params["init_sk"])
    r1 = jax.lax.reduce_window(r0, -jnp.inf, jax.lax.max, (1, 3, 3, 1), (1, 2, 2, 1),
                               [(0, 0), (1, 1), (1, 1), (0, 0)])
    assert jnp.allclose(g0, r0, atol=5e-2, rtol=5e-2), (
        "stem x0 mismatch", float(jnp.max(jnp.abs(g0 - r0))))
    assert jnp.allclose(g1, r1, atol=5e-2, rtol=5e-2), (
        "stem x1 mismatch", float(jnp.max(jnp.abs(g1 - r1))))


def _self_check():
    init = _Init(seed=42)
    keys = jax.random.split(jax.random.PRNGKey(123), 4)
    # stride-1 bottleneck + downsample + single-chunk SKConv
    _check_block(init, keys[0], H=8, W=8, cin=32, planes=16, stride=1, with_sk=True)
    # stride-2 bottleneck + downsample (even-row conv path + wrapper column slice)
    _check_block(init, keys[1], H=8, W=8, cin=64, planes=32, stride=2, with_sk=False)
    # multi-chunk SKConv (C=256 -> two 128-lane block-diagonal chunks)
    _check_block(init, keys[2], H=4, W=4, cin=256, planes=64, stride=1, with_sk=True)
    # fused stem: 7x7/s2 conv + SKConv + maxpool on a small 16x16 input
    _check_stem(init, keys[3])


# ------------------------------------ main -------------------------------------

if __name__ == "__main__":
    _self_check()

    base_channels = 16  # must be a multiple of 16 (SKConv uses G=16 groups)
    params = make_resnet50_encoder(base_channels=base_channels, seed=0)

    x = jax.random.normal(jax.random.PRNGKey(0), (2, 3, 64, 64), jnp.float32)
    fwd = jax.jit(lambda inp: resnet50_encoder_forward(params, inp))
    outs = jax.block_until_ready(fwd(x))

    expected = [
        (2, base_channels, 32, 32),        # x0
        (2, base_channels * 4, 16, 16),    # x2
        (2, base_channels * 8, 8, 8),      # x3
        (2, base_channels * 16, 4, 4),     # x4
        (2, base_channels * 32, 2, 2),     # x5
    ]
    for o, e in zip(outs, expected):
        assert o.shape == e, (o.shape, e)
        assert bool(jnp.all(jnp.isfinite(o)))
    print("KERNEL_OK")
</pallas_src>

<mosaic_0001>
module attributes {stable_mosaic.version = 11 : i64} {
  func.func @kernel(%arg0: i32, %arg1: memref<1x64x32xbf16, #tpu.memory_space<vmem>>, %arg2: memref<32x16xbf16, #tpu.memory_space<vmem>>, %arg3: memref<1x16xf32, #tpu.memory_space<vmem>>, %arg4: memref<9x16x16xbf16, #tpu.memory_space<vmem>>, %arg5: memref<1x16xf32, #tpu.memory_space<vmem>>, %arg6: memref<16x64xbf16, #tpu.memory_space<vmem>>, %arg7: memref<1x64xf32, #tpu.memory_space<vmem>>, %arg8: memref<32x64xbf16, #tpu.memory_space<vmem>>, %arg9: memref<1x64xf32, #tpu.memory_space<vmem>>, %arg10: memref<9x64x64xbf16, #tpu.memory_space<vmem>>, %arg11: memref<1x64xf32, #tpu.memory_space<vmem>>, %arg12: memref<1x64x64xbf16, #tpu.memory_space<vmem>>, %arg13: memref<120x16xf32, #tpu.memory_space<vmem>>, %arg14: memref<120x64xf32, #tpu.memory_space<vmem>>) attributes {dimension_semantics = [#tpu.dimension_semantics<parallel>], iteration_bounds = array<i64: 2>, scalar_prefetch = 0 : i64, scratch_operands = 2 : i64, tpu.core_type = #tpu.core_type<tc>, window_params = [{transform_indices = @transform_0, window_bounds = array<i64: 1, 64, 32>}, {pipeline_mode = #tpu.pipeline_mode<synchronous>, transform_indices = @transform_1, window_bounds = array<i64: 32, 16>}, {pipeline_mode = #tpu.pipeline_mode<synchronous>, transform_indices = @transform_2, window_bounds = array<i64: 1, 16>}, {pipeline_mode = #tpu.pipeline_mode<synchronous>, transform_indices = @transform_3, window_bounds = array<i64: 9, 16, 16>}, {pipeline_mode = #tpu.pipeline_mode<synchronous>, transform_indices = @transform_4, window_bounds = array<i64: 1, 16>}, {pipeline_mode = #tpu.pipeline_mode<synchronous>, transform_indices = @transform_5, window_bounds = array<i64: 16, 64>}, {pipeline_mode = #tpu.pipeline_mode<synchronous>, transform_indices = @transform_6, window_bounds = array<i64: 1, 64>}, {pipeline_mode = #tpu.pipeline_mode<synchronous>, transform_indices = @transform_7, window_bounds = array<i64: 32, 64>}, {pipeline_mode = #tpu.pipeline_mode<synchronous>, transform_indices = @transform_8, window_bounds = array<i64: 1, 64>}, {pipeline_mode = #tpu.pipeline_mode<synchronous>, transform_indices = @transform_9, window_bounds = array<i64: 9, 64, 64>}, {pipeline_mode = #tpu.pipeline_mode<synchronous>, transform_indices = @transform_10, window_bounds = array<i64: 1, 64>}, {transform_indices = @transform_11, window_bounds = array<i64: 1, 64, 64>}]} {
    %c0 = arith.constant 0 : index
    %c0_0 = arith.constant 0 : index
    %c0_1 = arith.constant 0 : index
    %0 = vector.load %arg1[%c0, %c0_0, %c0_1] : memref<1x64x32xbf16, #tpu.memory_space<vmem>>, vector<1x64x32xbf16>
    %1 = vector.shape_cast %0 : vector<1x64x32xbf16> to vector<64x32xbf16>
    %c0_2 = arith.constant 0 : index
    %c0_3 = arith.constant 0 : index
    %2 = vector.load %arg2[%c0_2, %c0_3] : memref<32x16xbf16, #tpu.memory_space<vmem>>, vector<32x16xbf16>
    %cst = arith.constant dense<0.000000e+00> : vector<64x16xf32>
    %3 = tpu.matmul %1, %2, %cst {dimension_numbers = #tpu.dot_dimension_numbers<[1], [0], [0], [1], [0, 0, 1, 1], [], []>} : vector<64x32xbf16>, vector<32x16xbf16>, vector<64x16xf32> -> vector<64x16xf32>
    %c0_4 = arith.constant 0 : index
    %c0_5 = arith.constant 0 : index
    %4 = vector.load %arg3[%c0_4, %c0_5] : memref<1x16xf32, #tpu.memory_space<vmem>>, vector<1x16xf32>
    %5 = vector.broadcast %4 : vector<1x16xf32> to vector<64x16xf32>
    %6 = arith.addf %3, %5 : vector<64x16xf32>
    %cst_6 = arith.constant 0.000000e+00 : f32
    %7 = vector.broadcast %cst_6 : f32 to vector<64x16xf32>
    %8 = arith.maximumf %6, %7 : vector<64x16xf32>
    %cst_7 = arith.constant 0.000000e+00 : f32
    %9 = vector.broadcast %cst_7 : f32 to vector<120x16xf32>
    %c0_8 = arith.constant 0 : index
    %c0_9 = arith.constant 0 : index
    %10 = vector.load %arg13[%c0_8, %c0_9] : memref<120x16xf32, #tpu.memory_space<vmem>>, vector<120x16xf32>
    tpu.vector_store %arg13[%c0_8, %c0_9], %9 {strides = array<i32>} : memref<120x16xf32, #tpu.memory_space<vmem>>, vector<120x16xf32>,
    %11 = vector.extract_strided_slice %8 {offsets = [0, 0], sizes = [8, 16], strides = [1, 1]} : vector<64x16xf32> to vector<8x16xf32>
    %c11 = arith.constant 11 : index
    %c0_10 = arith.constant 0 : index
    %12 = vector.load %arg13[%c11, %c0_10] : memref<120x16xf32, #tpu.memory_space<vmem>>, vector<8x16xf32>
    tpu.vector_store %arg13[%c11, %c0_10], %11 {strides = array<i32>} : memref<120x16xf32, #tpu.memory_space<vmem>>, vector<8x16xf32>,
    %13 = vector.extract_strided_slice %8 {offsets = [8, 0], sizes = [8, 16], strides = [1, 1]} : vector<64x16xf32> to vector<8x16xf32>
    %c21 = arith.constant 21 : index
    %c0_11 = arith.constant 0 : index
    %14 = vector.load %arg13[%c21, %c0_11] : memref<120x16xf32, #tpu.memory_space<vmem>>, vector<8x16xf32>
    tpu.vector_store %arg13[%c21, %c0_11], %13 {strides = array<i32>} : memref<120x16xf32, #tpu.memory_space<vmem>>, vector<8x16xf32>,
    %15 = vector.extract_strided_slice %8 {offsets = [16, 0], sizes = [8, 16], strides = [1, 1]} : vector<64x16xf32> to vector<8x16xf32>
    %c31 = arith.constant 31 : index
    %c0_12 = arith.constant 0 : index
    %16 = vector.load %arg13[%c31, %c0_12] : memref<120x16xf32, #tpu.memory_space<vmem>>, vector<8x16xf32>
    tpu.vector_store %arg13[%c31, %c0_12], %15 {strides = array<i32>} : memref<120x16xf32, #tpu.memory_space<vmem>>, vector<8x16xf32>,
    %17 = vector.extract_strided_slice %8 {offsets = [24, 0], sizes = [8, 16], strides = [1, 1]} : vector<64x16xf32> to vector<8x16xf32>
    %c41 = arith.constant 41 : index
    %c0_13 = arith.constant 0 : index
    %18 = vector.load %arg13[%c41, %c0_13] : memref<120x16xf32, #tpu.memory_space<vmem>>, vector<8x16xf32>
    tpu.vector_store %arg13[%c41, %c0_13], %17 {strides = array<i32>} : memref<120x16xf32, #tpu.memory_space<vmem>>, vector<8x16xf32>,
    %19 = vector.extract_strided_slice %8 {offsets = [32, 0], sizes = [8, 16], strides = [1, 1]} : vector<64x16xf32> to vector<8x16xf32>
    %c51 = arith.constant 51 : index
    %c0_14 = arith.constant 0 : index
    %20 = vector.load %arg13[%c51, %c0_14] : memref<120x16xf32, #tpu.memory_space<vmem>>, vector<8x16xf32>
    tpu.vector_store %arg13[%c51, %c0_14], %19 {strides = array<i32>} : memref<120x16xf32, #tpu.memory_space<vmem>>, vector<8x16xf32>,
    %21 = vector.extract_strided_slice %8 {offsets = [40, 0], sizes = [8, 16], strides = [1, 1]} : vector<64x16xf32> to vector<8x16xf32>
    %c61 = arith.constant 61 : index
    %c0_15 = arith.constant 0 : index
    %22 = vector.load %arg13[%c61, %c0_15] : memref<120x16xf32, #tpu.memory_space<vmem>>, vector<8x16xf32>
    tpu.vector_store %arg13[%c61, %c0_15], %21 {strides = array<i32>} : memref<120x16xf32, #tpu.memory_space<vmem>>, vector<8x16xf32>,
    %23 = vector.extract_strided_slice %8 {offsets = [48, 0], sizes = [8, 16], strides = [1, 1]} : vector<64x16xf32> to vector<8x16xf32>
    %c71 = arith.constant 71 : index
    %c0_16 = arith.constant 0 : index
    %24 = vector.load %arg13[%c71, %c0_16] : memref<120x16xf32, #tpu.memory_space<vmem>>, vector<8x16xf32>
    tpu.vector_store %arg13[%c71, %c0_16], %23 {strides = array<i32>} : memref<120x16xf32, #tpu.memory_space<vmem>>, vector<8x16xf32>,
    %25 = vector.extract_strided_slice %8 {offsets = [56, 0], sizes = [8, 16], strides = [1, 1]} : vector<64x16xf32> to vector<8x16xf32>
    %c81 = arith.constant 81 : index
    %c0_17 = arith.constant 0 : index
    %26 = vector.load %arg13[%c81, %c0_17] : memref<120x16xf32, #tpu.memory_space<vmem>>, vector<8x16xf32>
    tpu.vector_store %arg13[%c81, %c0_17], %25 {strides = array<i32>} : memref<120x16xf32, #tpu.memory_space<vmem>>, vector<8x16xf32>,
    %cst_18 = arith.constant 0.000000e+00 : f32
    %27 = vector.broadcast %cst_18 : f32 to vector<80x16xf32>
    %c0_19 = arith.constant 0 : index
    %c0_20 = arith.constant 0 : index
    %28 = vector.load %arg13[%c0_19, %c0_20] : memref<120x16xf32, #tpu.memory_space<vmem>>, vector<80x16xf32>
    %29 = arith.truncf %28 : vector<80x16xf32> to vector<80x16xbf16>
    %c0_21 = arith.constant 0 : index
    %c0_22 = arith.constant 0 : index
    %c0_23 = arith.constant 0 : index
    %30 = vector.load %arg4[%c0_21, %c0_22, %c0_23] : memref<9x16x16xbf16, #tpu.memory_space<vmem>>, vector<1x16x16xbf16>
    %31 = vector.shape_cast %30 : vector<1x16x16xbf16> to vector<16x16xbf16>
    %cst_24 = arith.constant dense<0.000000e+00> : vector<80x16xf32>
    %32 = tpu.matmul %29, %31, %cst_24 {dimension_numbers = #tpu.dot_dimension_numbers<[1], [0], [0], [1], [0, 0, 1, 1], [], []>} : vector<80x16xbf16>, vector<16x16xbf16>, vector<80x16xf32> -> vector<80x16xf32>
    %33 = arith.addf %27, %32 : vector<80x16xf32>
    %c1 = arith.constant 1 : index
    %c0_25 = arith.constant 0 : index
    %34 = vector.load %arg13[%c1, %c0_25] : memref<120x16xf32, #tpu.memory_space<vmem>>, vector<80x16xf32>
    %35 = arith.truncf %34 : vector<80x16xf32> to vector<80x16xbf16>
    %c1_26 = arith.constant 1 : index
    %c0_27 = arith.constant 0 : index
    %c0_28 = arith.constant 0 : index
    %36 = vector.load %arg4[%c1_26, %c0_27, %c0_28] : memref<9x16x16xbf16, #tpu.memory_space<vmem>>, vector<1x16x16xbf16>
    %37 = vector.shape_cast %36 : vector<1x16x16xbf16> to vector<16x16xbf16>
    %cst_29 = arith.constant dense<0.000000e+00> : vector<80x16xf32>
    %38 = tpu.matmul %35, %37, %cst_29 {dimension_numbers = #tpu.dot_dimension_numbers<[1], [0], [0], [1], [0, 0, 1, 1], [], []>} : vector<80x16xbf16>, vector<16x16xbf16>, vector<80x16xf32> -> vector<80x16xf32>
    %39 = arith.addf %33, %38 : vector<80x16xf32>
    %c2 = arith.constant 2 : index
    %c0_30 = arith.constant 0 : index
    %40 = vector.load %arg13[%c2, %c0_30] : memref<120x16xf32, #tpu.memory_space<vmem>>, vector<80x16xf32>
    %41 = arith.truncf %40 : vector<80x16xf32> to vector<80x16xbf16>
    %c2_31 = arith.constant 2 : index
    %c0_32 = arith.constant 0 : index
    %c0_33 = arith.constant 0 : index
    %42 = vector.load %arg4[%c2_31, %c0_32, %c0_33] : memref<9x16x16xbf16, #tpu.memory_space<vmem>>, vector<1x16x16xbf16>
    %43 = vector.shape_cast %42 : vector<1x16x16xbf16> to vector<16x16xbf16>
    %cst_34 = arith.constant dense<0.000000e+00> : vector<80x16xf32>
    %44 = tpu.matmul %41, %43, %cst_34 {dimension_numbers = #tpu.dot_dimension_numbers<[1], [0], [0], [1], [0, 0, 1, 1], [], []>} : vector<80x16xbf16>, vector<16x16xbf16>, vector<80x16xf32> -> vector<80x16xf32>
    %45 = arith.addf %39, %44 : vector<80x16xf32>
    %c10 = arith.constant 10 : index
    %c0_35 = arith.constant 0 : index
    %46 = vector.load %arg13[%c10, %c0_35] : memref<120x16xf32, #tpu.memory_space<vmem>>, vector<80x16xf32>
    %47 = arith.truncf %46 : vector<80x16xf32> to vector<80x16xbf16>
    %c3 = arith.constant 3 : index
    %c0_36 = arith.constant 0 : index
    %c0_37 = arith.constant 0 : index
    %48 = vector.load %arg4[%c3, %c0_36, %c0_37] : memref<9x16x16xbf16, #tpu.memory_space<vmem>>, vector<1x16x16xbf16>
    %49 = vector.shape_cast %48 : vector<1x16x16xbf16> to vector<16x16xbf16>
    %cst_38 = arith.constant dense<0.000000e+00> : vector<80x16xf32>
    %50 = tpu.matmul %47, %49, %cst_38 {dimension_numbers = #tpu.dot_dimension_numbers<[1], [0], [0], [1], [0, 0, 1, 1], [], []>} : vector<80x16xbf16>, vector<16x16xbf16>, vector<80x16xf32> -> vector<80x16xf32>
    %51 = arith.addf %45, %50 : vector<80x16xf32>
    %c11_39 = arith.constant 11 : index
    %c0_40 = arith.constant 0 : index
    %52 = vector.load %arg13[%c11_39, %c0_40] : memref<120x16xf32, #tpu.memory_space<vmem>>, vector<80x16xf32>
    %53 = arith.truncf %52 : vector<80x16xf32> to vector<80x16xbf16>
    %c4 = arith.constant 4 : index
    %c0_41 = arith.constant 0 : index
    %c0_42 = arith.constant 0 : index
    %54 = vector.load %arg4[%c4, %c0_41, %c0_42] : memref<9x16x16xbf16, #tpu.memory_space<vmem>>, vector<1x16x16xbf16>
    %55 = vector.shape_cast %54 : vector<1x16x16xbf16> to vector<16x16xbf16>
    %cst_43 = arith.constant dense<0.000000e+00> : vector<80x16xf32>
    %56 = tpu.matmul %53, %55, %cst_43 {dimension_numbers = #tpu.dot_dimension_numbers<[1], [0], [0], [1], [0, 0, 1, 1], [], []>} : vector<80x16xbf16>, vector<16x16xbf16>, vector<80x16xf32> -> vector<80x16xf32>
    %57 = arith.addf %51, %56 : vector<80x16xf32>
    %c12 = arith.constant 12 : index
    %c0_44 = arith.constant 0 : index
    %58 = vector.load %arg13[%c12, %c0_44] : memref<120x16xf32, #tpu.memory_space<vmem>>, vector<80x16xf32>
    %59 = arith.truncf %58 : vector<80x16xf32> to vector<80x16xbf16>
    %c5 = arith.constant 5 : index
    %c0_45 = arith.constant 0 : index
    %c0_46 = arith.constant 0 : index
    %60 = vector.load %arg4[%c5, %c0_45, %c0_46] : memref<9x16x16xbf16, #tpu.memory_space<vmem>>, vector<1x16x16xbf16>
    %61 = vector.shape_cast %60 : vector<1x16x16xbf16> to vector<16x16xbf16>
    %cst_47 = arith.constant dense<0.000000e+00> : vector<80x16xf32>
    %62 = tpu.matmul %59, %61, %cst_47 {dimension_numbers = #tpu.dot_dimension_numbers<[1], [0], [0], [1], [0, 0, 1, 1], [], []>} : vector<80x16xbf16>, vector<16x16xbf16>, vector<80x16xf32> -> vector<80x16xf32>
    %63 = arith.addf %57, %62 : vector<80x16xf32>
    %c20 = arith.constant 20 : index
    %c0_48 = arith.constant 0 : index
    %64 = vector.load %arg13[%c20, %c0_48] : memref<120x16xf32, #tpu.memory_space<vmem>>, vector<80x16xf32>
    %65 = arith.truncf %64 : vector<80x16xf32> to vector<80x16xbf16>
    %c6 = arith.constant 6 : index
    %c0_49 = arith.constant 0 : index
    %c0_50 = arith.constant 0 : index
    %66 = vector.load %arg4[%c6, %c0_49, %c0_50] : memref<9x16x16xbf16, #tpu.memory_space<vmem>>, vector<1x16x16xbf16>
    %67 = vector.shape_cast %66 : vector<1x16x16xbf16> to vector<16x16xbf16>
    %cst_51 = arith.constant dense<0.000000e+00> : vector<80x16xf32>
    %68 = tpu.matmul %65, %67, %cst_51 {dimension_numbers = #tpu.dot_dimension_numbers<[1], [0], [0], [1], [0, 0, 1, 1], [], []>} : vector<80x16xbf16>, vector<16x16xbf16>, vector<80x16xf32> -> vector<80x16xf32>
    %69 = arith.addf %63, %68 : vector<80x16xf32>
    %c21_52 = arith.constant 21 : index
    %c0_53 = arith.constant 0 : index
    %70 = vector.load %arg13[%c21_52, %c0_53] : memref<120x16xf32, #tpu.memory_space<vmem>>, vector<80x16xf32>
    %71 = arith.truncf %70 : vector<80x16xf32> to vector<80x16xbf16>
    %c7 = arith.constant 7 : index
    %c0_54 = arith.constant 0 : index
    %c0_55 = arith.constant 0 : index
    %72 = vector.load %arg4[%c7, %c0_54, %c0_55] : memref<9x16x16xbf16, #tpu.memory_space<vmem>>, vector<1x16x16xbf16>
    %73 = vector.shape_cast %72 : vector<1x16x16xbf16> to vector<16x16xbf16>
    %cst_56 = arith.constant dense<0.000000e+00> : vector<80x16xf32>
    %74 = tpu.matmul %71, %73, %cst_56 {dimension_numbers = #tpu.dot_dimension_numbers<[1], [0], [0], [1], [0, 0, 1, 1], [], []>} : vector<80x16xbf16>, vector<16x16xbf16>, vector<80x16xf32> -> vector<80x16xf32>
    %75 = arith.addf %69, %74 : vector<80x16xf32>
    %c22 = arith.constant 22 : index
    %c0_57 = arith.constant 0 : index
    %76 = vector.load %arg13[%c22, %c0_57] : memref<120x16xf32, #tpu.memory_space<vmem>>, vector<80x16xf32>
    %77 = arith.truncf %76 : vector<80x16xf32> to vector<80x16xbf16>
    %c8 = arith.constant 8 : index
    %c0_58 = arith.constant 0 : index
    %c0_59 = arith.constant 0 : index
    %78 = vector.load %arg4[%c8, %c0_58, %c0_59] : memref<9x16x16xbf16, #tpu.memory_space<vmem>>, vector<1x16x16xbf16>
    %79 = vector.shape_cast %78 : vector<1x16x16xbf16> to vector<16x16xbf16>
    %cst_60 = arith.constant dense<0.000000e+00> : vector<80x16xf32>
    %80 = tpu.matmul %77, %79, %cst_60 {dimension_numbers = #tpu.dot_dimension_numbers<[1], [0], [0], [1], [0, 0, 1, 1], [], []>} : vector<80x16xbf16>, vector<16x16xbf16>, vector<80x16xf32> -> vector<80x16xf32>
    %81 = arith.addf %75, %80 : vector<80x16xf32>
    %c0_61 = arith.constant 0 : index
    %c0_62 = arith.constant 0 : index
    %82 = vector.load %arg5[%c0_61, %c0_62] : memref<1x16xf32, #tpu.memory_space<vmem>>, vector<1x16xf32>
    %83 = vector.broadcast %82 : vector<1x16xf32> to vector<80x16xf32>
    %84 = arith.addf %81, %83 : vector<80x16xf32>
    %cst_63 = arith.constant 0.000000e+00 : f32
    %85 = vector.broadcast %cst_63 : f32 to vector<80x16xf32>
    %86 = arith.maximumf %84, %85 : vector<80x16xf32>
    %87 = arith.truncf %86 : vector<80x16xf32> to vector<80x16xbf16>
    %88 = vector.extract_strided_slice %87 {offsets = [0, 0], sizes = [8, 16], strides = [1, 1]} : vector<80x16xbf16> to vector<8x16xbf16>
    %89 = vector.extract_strided_slice %87 {offsets = [10, 0], sizes = [8, 16], strides = [1, 1]} : vector<80x16xbf16> to vector<8x16xbf16>
    %90 = vector.extract_strided_slice %87 {offsets = [20, 0], sizes = [8, 16], strides = [1, 1]} : vector<80x16xbf16> to vector<8x16xbf16>
    %91 = vector.extract_strided_slice %87 {offsets = [30, 0], sizes = [8, 16], strides = [1, 1]} : vector<80x16xbf16> to vector<8x16xbf16>
    %92 = vector.extract_strided_slice %87 {offsets = [40, 0], sizes = [8, 16], strides = [1, 1]} : vector<80x16xbf16> to vector<8x16xbf16>
    %93 = vector.extract_strided_slice %87 {offsets = [50, 0], sizes = [8, 16], strides = [1, 1]} : vector<80x16xbf16> to vector<8x16xbf16>
    %94 = vector.extract_strided_slice %87 {offsets = [60, 0], sizes = [8, 16], strides = [1, 1]} : vector<80x16xbf16> to vector<8x16xbf16>
    %95 = vector.extract_strided_slice %87 {offsets = [70, 0], sizes = [8, 16], strides = [1, 1]} : vector<80x16xbf16> to vector<8x16xbf16>
    %96 = tpu.concatenate %88, %89, %90, %91, %92, %93, %94, %95 in 0 : vector<8x16xbf16>, vector<8x16xbf16>, vector<8x16xbf16>, vector<8x16xbf16>, vector<8x16xbf16>, vector<8x16xbf16>, vector<8x16xbf16>, vector<8x16xbf16> -> vector<64x16xbf16>
    %c0_64 = arith.constant 0 : index
    %c0_65 = arith.constant 0 : index
    %97 = vector.load %arg6[%c0_64, %c0_65] : memref<16x64xbf16, #tpu.memory_space<vmem>>, vector<16x64xbf16>
    %cst_66 = arith.constant dense<0.000000e+00> : vector<64x64xf32>
    %98 = tpu.matmul %96, %97, %cst_66 {dimension_numbers = #tpu.dot_dimension_numbers<[1], [0], [0], [1], [0, 0, 1, 1], [], []>} : vector<64x16xbf16>, vector<16x64xbf16>, vector<64x64xf32> -> vector<64x64xf32>
    %c0_67 = arith.constant 0 : index
    %c0_68 = arith.constant 0 : index
    %99 = vector.load %arg7[%c0_67, %c0_68] : memref<1x64xf32, #tpu.memory_space<vmem>>, vector<1x64xf32>
    %100 = vector.broadcast %99 : vector<1x64xf32> to vector<64x64xf32>
    %101 = arith.addf %98, %100 : vector<64x64xf32>
    %c0_69 = arith.constant 0 : index
    %c0_70 = arith.constant 0 : index
    %102 = vector.load %arg8[%c0_69, %c0_70] : memref<32x64xbf16, #tpu.memory_space<vmem>>, vector<32x64xbf16>
    %cst_71 = arith.constant dense<0.000000e+00> : vector<64x64xf32>
    %103 = tpu.matmul %1, %102, %cst_71 {dimension_numbers = #tpu.dot_dimension_numbers<[1], [0], [0], [1], [0, 0, 1, 1], [], []>} : vector<64x32xbf16>, vector<32x64xbf16>, vector<64x64xf32> -> vector<64x64xf32>
    %c0_72 = arith.constant 0 : index
    %c0_73 = arith.constant 0 : index
    %104 = vector.load %arg9[%c0_72, %c0_73] : memref<1x64xf32, #tpu.memory_space<vmem>>, vector<1x64xf32>
    %105 = vector.broadcast %104 : vector<1x64xf32> to vector<64x64xf32>
    %106 = arith.addf %103, %105 : vector<64x64xf32>
    %107 = arith.addf %101, %106 : vector<64x64xf32>
    %cst_74 = arith.constant 0.000000e+00 : f32
    %108 = vector.broadcast %cst_74 : f32 to vector<64x64xf32>
    %109 = arith.maximumf %107, %108 : vector<64x64xf32>
    %cst_75 = arith.constant 0.000000e+00 : f32
    %110 = vector.broadcast %cst_75 : f32 to vector<120x64xf32>
    %c0_76 = arith.constant 0 : index
    %c0_77 = arith.constant 0 : index
    %111 = vector.load %arg14[%c0_76, %c0_77] : memref<120x64xf32, #tpu.memory_space<vmem>>, vector<120x64xf32>
    tpu.vector_store %arg14[%c0_76, %c0_77], %110 {strides = array<i32>} : memref<120x64xf32, #tpu.memory_space<vmem>>, vector<120x64xf32>,
    %112 = vector.extract_strided_slice %109 {offsets = [0, 0], sizes = [8, 64], strides = [1, 1]} : vector<64x64xf32> to vector<8x64xf32>
    %c11_78 = arith.constant 11 : index
    %c0_79 = arith.constant 0 : index
    %113 = vector.load %arg14[%c11_78, %c0_79] : memref<120x64xf32, #tpu.memory_space<vmem>>, vector<8x64xf32>
    tpu.vector_store %arg14[%c11_78, %c0_79], %112 {strides = array<i32>} : memref<120x64xf32, #tpu.memory_space<vmem>>, vector<8x64xf32>,
    %114 = vector.extract_strided_slice %109 {offsets = [8, 0], sizes = [8, 64], strides = [1, 1]} : vector<64x64xf32> to vector<8x64xf32>
    %c21_80 = arith.constant 21 : index
    %c0_81 = arith.constant 0 : index
    %115 = vector.load %arg14[%c21_80, %c0_81] : memref<120x64xf32, #tpu.memory_space<vmem>>, vector<8x64xf32>
    tpu.vector_store %arg14[%c21_80, %c0_81], %114 {strides = array<i32>} : memref<120x64xf32, #tpu.memory_space<vmem>>, vector<8x64xf32>,
    %116 = vector.extract_strided_slice %109 {offsets = [16, 0], sizes = [8, 64], strides = [1, 1]} : vector<64x64xf32> to vector<8x64xf32>
    %c31_82 = arith.constant 31 : index
    %c0_83 = arith.constant 0 : index
    %117 = vector.load %arg14[%c31_82, %c0_83] : memref<120x64xf32, #tpu.memory_space<vmem>>, vector<8x64xf32>
    tpu.vector_store %arg14[%c31_82, %c0_83], %116 {strides = array<i32>} : memref<120x64xf32, #tpu.memory_space<vmem>>, vector<8x64xf32>,
    %118 = vector.extract_strided_slice %109 {offsets = [24, 0], sizes = [8, 64], strides = [1, 1]} : vector<64x64xf32> to vector<8x64xf32>
    %c41_84 = arith.constant 41 : index
    %c0_85 = arith.constant 0 : index
    %119 = vector.load %arg14[%c41_84, %c0_85] : memref<120x64xf32, #tpu.memory_space<vmem>>, vector<8x64xf32>
    tpu.vector_store %arg14[%c41_84, %c0_85], %118 {strides = array<i32>} : memref<120x64xf32, #tpu.memory_space<vmem>>, vector<8x64xf32>,
    %120 = vector.extract_strided_slice %109 {offsets = [32, 0], sizes = [8, 64], strides = [1, 1]} : vector<64x64xf32> to vector<8x64xf32>
    %c51_86 = arith.constant 51 : index
    %c0_87 = arith.constant 0 : index
    %121 = vector.load %arg14[%c51_86, %c0_87] : memref<120x64xf32, #tpu.memory_space<vmem>>, vector<8x64xf32>
    tpu.vector_store %arg14[%c51_86, %c0_87], %120 {strides = array<i32>} : memref<120x64xf32, #tpu.memory_space<vmem>>, vector<8x64xf32>,
    %122 = vector.extract_strided_slice %109 {offsets = [40, 0], sizes = [8, 64], strides = [1, 1]} : vector<64x64xf32> to vector<8x64xf32>
    %c61_88 = arith.constant 61 : index
    %c0_89 = arith.constant 0 : index
    %123 = vector.load %arg14[%c61_88, %c0_89] : memref<120x64xf32, #tpu.memory_space<vmem>>, vector<8x64xf32>
    tpu.vector_store %arg14[%c61_88, %c0_89], %122 {strides = array<i32>} : memref<120x64xf32, #tpu.memory_space<vmem>>, vector<8x64xf32>,
    %124 = vector.extract_strided_slice %109 {offsets = [48, 0], sizes = [8, 64], strides = [1, 1]} : vector<64x64xf32> to vector<8x64xf32>
    %c71_90 = arith.constant 71 : index
    %c0_91 = arith.constant 0 : index
    %125 = vector.load %arg14[%c71_90, %c0_91] : memref<120x64xf32, #tpu.memory_space<vmem>>, vector<8x64xf32>
    tpu.vector_store %arg14[%c71_90, %c0_91], %124 {strides = array<i32>} : memref<120x64xf32, #tpu.memory_space<vmem>>, vector<8x64xf32>,
    %126 = vector.extract_strided_slice %109 {offsets = [56, 0], sizes = [8, 64], strides = [1, 1]} : vector<64x64xf32> to vector<8x64xf32>
    %c81_92 = arith.constant 81 : index
    %c0_93 = arith.constant 0 : index
    %127 = vector.load %arg14[%c81_92, %c0_93] : memref<120x64xf32, #tpu.memory_space<vmem>>, vector<8x64xf32>
    tpu.vector_store %arg14[%c81_92, %c0_93], %126 {strides = array<i32>} : memref<120x64xf32, #tpu.memory_space<vmem>>, vector<8x64xf32>,
    %cst_94 = arith.constant 0.000000e+00 : f32
    %128 = vector.broadcast %cst_94 : f32 to vector<80x64xf32>
    %c0_95 = arith.constant 0 : index
    %c0_96 = arith.constant 0 : index
    %129 = vector.load %arg14[%c0_95, %c0_96] : memref<120x64xf32, #tpu.memory_space<vmem>>, vector<80x64xf32>
    %130 = arith.truncf %129 : vector<80x64xf32> to vector<80x64xbf16>
    %c0_97 = arith.constant 0 : index
    %c0_98 = arith.constant 0 : index
    %c0_99 = arith.constant 0 : index
    %131 = vector.load %arg10[%c0_97, %c0_98, %c0_99] : memref<9x64x64xbf16, #tpu.memory_space<vmem>>, vector<1x64x64xbf16>
    %132 = vector.shape_cast %131 : vector<1x64x64xbf16> to vector<64x64xbf16>
    %cst_100 = arith.constant dense<0.000000e+00> : vector<80x64xf32>
    %133 = tpu.matmul %130, %132, %cst_100 {dimension_numbers = #tpu.dot_dimension_numbers<[1], [0], [0], [1], [0, 0, 1, 1], [], []>} : vector<80x64xbf16>, vector<64x64xbf16>, vector<80x64xf32> -> vector<80x64xf32>
    %134 = arith.addf %128, %133 : vector<80x64xf32>
    %c1_101 = arith.constant 1 : index
    %c0_102 = arith.constant 0 : index
    %135 = vector.load %arg14[%c1_101, %c0_102] : memref<120x64xf32, #tpu.memory_space<vmem>>, vector<80x64xf32>
    %136 = arith.truncf %135 : vector<80x64xf32> to vector<80x64xbf16>
    %c1_103 = arith.constant 1 : index
    %c0_104 = arith.constant 0 : index
    %c0_105 = arith.constant 0 : index
    %137 = vector.load %arg10[%c1_103, %c0_104, %c0_105] : memref<9x64x64xbf16, #tpu.memory_space<vmem>>, vector<1x64x64xbf16>
    %138 = vector.shape_cast %137 : vector<1x64x64xbf16> to vector<64x64xbf16>
    %cst_106 = arith.constant dense<0.000000e+00> : vector<80x64xf32>
    %139 = tpu.matmul %136, %138, %cst_106 {dimension_numbers = #tpu.dot_dimension_numbers<[1], [0], [0], [1], [0, 0, 1, 1], [], []>} : vector<80x64xbf16>, vector<64x64xbf16>, vector<80x64xf32> -> vector<80x64xf32>
    %140 = arith.addf %134, %139 : vector<80x64xf32>
    %c2_107 = arith.constant 2 : index
    %c0_108 = arith.constant 0 : index
    %141 = vector.load %arg14[%c2_107, %c0_108] : memref<120x64xf32, #tpu.memory_space<vmem>>, vector<80x64xf32>
    %142 = arith.truncf %141 : vector<80x64xf32> to vector<80x64xbf16>
    %c2_109 = arith.constant 2 : index
    %c0_110 = arith.constant 0 : index
    %c0_111 = arith.constant 0 : index
    %143 = vector.load %arg10[%c2_109, %c0_110, %c0_111] : memref<9x64x64xbf16, #tpu.memory_space<vmem>>, vector<1x64x64xbf16>
    %144 = vector.shape_cast %143 : vector<1x64x64xbf16> to vector<64x64xbf16>
    %cst_112 = arith.constant dense<0.000000e+00> : vector<80x64xf32>
    %145 = tpu.matmul %142, %144, %cst_112 {dimension_numbers = #tpu.dot_dimension_numbers<[1], [0], [0], [1], [0, 0, 1, 1], [], []>} : vector<80x64xbf16>, vector<64x64xbf16>, vector<80x64xf32> -> vector<80x64xf32>
    %146 = arith.addf %140, %145 : vector<80x64xf32>
    %c10_113 = arith.constant 10 : index
    %c0_114 = arith.constant 0 : index
    %147 = vector.load %arg14[%c10_113, %c0_114] : memref<120x64xf32, #tpu.memory_space<vmem>>, vector<80x64xf32>
    %148 = arith.truncf %147 : vector<80x64xf32> to vector<80x64xbf16>
    %c3_115 = arith.constant 3 : index
    %c0_116 = arith.constant 0 : index
    %c0_117 = arith.constant 0 : index
    %149 = vector.load %arg10[%c3_115, %c0_116, %c0_117] : memref<9x64x64xbf16, #tpu.memory_space<vmem>>, vector<1x64x64xbf16>
    %150 = vector.shape_cast %149 : vector<1x64x64xbf16> to vector<64x64xbf16>
    %cst_118 = arith.constant dense<0.000000e+00> : vector<80x64xf32>
    %151 = tpu.matmul %148, %150, %cst_118 {dimension_numbers = #tpu.dot_dimension_numbers<[1], [0], [0], [1], [0, 0, 1, 1], [], []>} : vector<80x64xbf16>, vector<64x64xbf16>, vector<80x64xf32> -> vector<80x64xf32>
    %152 = arith.addf %146, %151 : vector<80x64xf32>
    %c11_119 = arith.constant 11 : index
    %c0_120 = arith.constant 0 : index
    %153 = vector.load %arg14[%c11_119, %c0_120] : memref<120x64xf32, #tpu.memory_space<vmem>>, vector<80x64xf32>
    %154 = arith.truncf %153 : vector<80x64xf32> to vector<80x64xbf16>
    %c4_121 = arith.constant 4 : index
    %c0_122 = arith.constant 0 : index
    %c0_123 = arith.constant 0 : index
    %155 = vector.load %arg10[%c4_121, %c0_122, %c0_123] : memref<9x64x64xbf16, #tpu.memory_space<vmem>>, vector<1x64x64xbf16>
    %156 = vector.shape_cast %155 : vector<1x64x64xbf16> to vector<64x64xbf16>
    %cst_124 = arith.constant dense<0.000000e+00> : vector<80x64xf32>
    %157 = tpu.matmul %154, %156, %cst_124 {dimension_numbers = #tpu.dot_dimension_numbers<[1], [0], [0], [1], [0, 0, 1, 1], [], []>} : vector<80x64xbf16>, vector<64x64xbf16>, vector<80x64xf32> -> vector<80x64xf32>
    %158 = arith.addf %152, %157 : vector<80x64xf32>
    %c12_125 = arith.constant 12 : index
    %c0_126 = arith.constant 0 : index
    %159 = vector.load %arg14[%c12_125, %c0_126] : memref<120x64xf32, #tpu.memory_space<vmem>>, vector<80x64xf32>
    %160 = arith.truncf %159 : vector<80x64xf32> to vector<80x64xbf16>
    %c5_127 = arith.constant 5 : index
    %c0_128 = arith.constant 0 : index
    %c0_129 = arith.constant 0 : index
    %161 = vector.load %arg10[%c5_127, %c0_128, %c0_129] : memref<9x64x64xbf16, #tpu.memory_space<vmem>>, vector<1x64x64xbf16>
    %162 = vector.shape_cast %161 : vector<1x64x64xbf16> to vector<64x64xbf16>
    %cst_130 = arith.constant dense<0.000000e+00> : vector<80x64xf32>
    %163 = tpu.matmul %160, %162, %cst_130 {dimension_numbers = #tpu.dot_dimension_numbers<[1], [0], [0], [1], [0, 0, 1, 1], [], []>} : vector<80x64xbf16>, vector<64x64xbf16>, vector<80x64xf32> -> vector<80x64xf32>
    %164 = arith.addf %158, %163 : vector<80x64xf32>
    %c20_131 = arith.constant 20 : index
    %c0_132 = arith.constant 0 : index
    %165 = vector.load %arg14[%c20_131, %c0_132] : memref<120x64xf32, #tpu.memory_space<vmem>>, vector<80x64xf32>
    %166 = arith.truncf %165 : vector<80x64xf32> to vector<80x64xbf16>
    %c6_133 = arith.constant 6 : index
    %c0_134 = arith.constant 0 : index
    %c0_135 = arith.constant 0 : index
    %167 = vector.load %arg10[%c6_133, %c0_134, %c0_135] : memref<9x64x64xbf16, #tpu.memory_space<vmem>>, vector<1x64x64xbf16>
    %168 = vector.shape_cast %167 : vector<1x64x64xbf16> to vector<64x64xbf16>
    %cst_136 = arith.constant dense<0.000000e+00> : vector<80x64xf32>
    %169 = tpu.matmul %166, %168, %cst_136 {dimension_numbers = #tpu.dot_dimension_numbers<[1], [0], [0], [1], [0, 0, 1, 1], [], []>} : vector<80x64xbf16>, vector<64x64xbf16>, vector<80x64xf32> -> vector<80x64xf32>
    %170 = arith.addf %164, %169 : vector<80x64xf32>
    %c21_137 = arith.constant 21 : index
    %c0_138 = arith.constant 0 : index
    %171 = vector.load %arg14[%c21_137, %c0_138] : memref<120x64xf32, #tpu.memory_space<vmem>>, vector<80x64xf32>
    %172 = arith.truncf %171 : vector<80x64xf32> to vector<80x64xbf16>
    %c7_139 = arith.constant 7 : index
    %c0_140 = arith.constant 0 : index
    %c0_141 = arith.constant 0 : index
    %173 = vector.load %arg10[%c7_139, %c0_140, %c0_141] : memref<9x64x64xbf16, #tpu.memory_space<vmem>>, vector<1x64x64xbf16>
    %174 = vector.shape_cast %173 : vector<1x64x64xbf16> to vector<64x64xbf16>
    %cst_142 = arith.constant dense<0.000000e+00> : vector<80x64xf32>
    %175 = tpu.matmul %172, %174, %cst_142 {dimension_numbers = #tpu.dot_dimension_numbers<[1], [0], [0], [1], [0, 0, 1, 1], [], []>} : vector<80x64xbf16>, vector<64x64xbf16>, vector<80x64xf32> -> vector<80x64xf32>
    %176 = arith.addf %170, %175 : vector<80x64xf32>
    %c22_143 = arith.constant 22 : index
    %c0_144 = arith.constant 0 : index
    %177 = vector.load %arg14[%c22_143, %c0_144] : memref<120x64xf32, #tpu.memory_space<vmem>>, vector<80x64xf32>
    %178 = arith.truncf %177 : vector<80x64xf32> to vector<80x64xbf16>
    %c8_145 = arith.constant 8 : index
    %c0_146 = arith.constant 0 : index
    %c0_147 = arith.constant 0 : index
    %179 = vector.load %arg10[%c8_145, %c0_146, %c0_147] : memref<9x64x64xbf16, #tpu.memory_space<vmem>>, vector<1x64x64xbf16>
    %180 = vector.shape_cast %179 : vector<1x64x64xbf16> to vector<64x64xbf16>
    %cst_148 = arith.constant dense<0.000000e+00> : vector<80x64xf32>
    %181 = tpu.matmul %178, %180, %cst_148 {dimension_numbers = #tpu.dot_dimension_numbers<[1], [0], [0], [1], [0, 0, 1, 1], [], []>} : vector<80x64xbf16>, vector<64x64xbf16>, vector<80x64xf32> -> vector<80x64xf32>
    %182 = arith.addf %176, %181 : vector<80x64xf32>
    %c0_149 = arith.constant 0 : index
    %c0_150 = arith.constant 0 : index
    %183 = vector.load %arg11[%c0_149, %c0_150] : memref<1x64xf32, #tpu.memory_space<vmem>>, vector<1x64xf32>
    %184 = vector.broadcast %183 : vector<1x64xf32> to vector<80x64xf32>
    %185 = arith.addf %182, %184 : vector<80x64xf32>
    %cst_151 = arith.constant 0.000000e+00 : f32
    %186 = vector.broadcast %cst_151 : f32 to vector<80x64xf32>
    %187 = arith.maximumf %185, %186 : vector<80x64xf32>
    %188 = arith.truncf %187 : vector<80x64xf32> to vector<80x64xbf16>
    %189 = vector.extract_strided_slice %188 {offsets = [0, 0], sizes = [8, 64], strides = [1, 1]} : vector<80x64xbf16> to vector<8x64xbf16>
    %190 = vector.extract_strided_slice %188 {offsets = [10, 0], sizes = [8, 64], strides = [1, 1]} : vector<80x64xbf16> to vector<8x64xbf16>
    %191 = vector.extract_strided_slice %188 {offsets = [20, 0], sizes = [8, 64], strides = [1, 1]} : vector<80x64xbf16> to vector<8x64xbf16>
    %192 = vector.extract_strided_slice %188 {offsets = [30, 0], sizes = [8, 64], strides = [1, 1]} : vector<80x64xbf16> to vector<8x64xbf16>
    %193 = vector.extract_strided_slice %188 {offsets = [40, 0], sizes = [8, 64], strides = [1, 1]} : vector<80x64xbf16> to vector<8x64xbf16>
    %194 = vector.extract_strided_slice %188 {offsets = [50, 0], sizes = [8, 64], strides = [1, 1]} : vector<80x64xbf16> to vector<8x64xbf16>
    %195 = vector.extract_strided_slice %188 {offsets = [60, 0], sizes = [8, 64], strides = [1, 1]} : vector<80x64xbf16> to vector<8x64xbf16>
    %196 = vector.extract_strided_slice %188 {offsets = [70, 0], sizes = [8, 64], strides = [1, 1]} : vector<80x64xbf16> to vector<8x64xbf16>
    %197 = tpu.concatenate %189, %190, %191, %192, %193, %194, %195, %196 in 0 : vector<8x64xbf16>, vector<8x64xbf16>, vector<8x64xbf16>, vector<8x64xbf16>, vector<8x64xbf16>, vector<8x64xbf16>, vector<8x64xbf16>, vector<8x64xbf16> -> vector<64x64xbf16>
    %c0_152 = arith.constant 0 : index
    %c0_153 = arith.constant 0 : index
    %c0_154 = arith.constant 0 : index
    %198 = vector.load %arg12[%c0_152, %c0_153, %c0_154] : memref<1x64x64xbf16, #tpu.memory_space<vmem>>, vector<1x64x64xbf16>
    %199 = vector.shape_cast %198 : vector<1x64x64xbf16> to vector<64x64xbf16>
    %200 = vector.shape_cast %197 : vector<64x64xbf16> to vector<1x64x64xbf16>
    tpu.vector_store %arg12[%c0_152, %c0_153, %c0_154], %200 {strides = array<i32>} : memref<1x64x64xbf16, #tpu.memory_space<vmem>>, vector<1x64x64xbf16>,
    return
  }
  func.func @transform_0(%arg0: i32) -> (i32, i32, i32) {
    %c0_i32 = arith.constant 0 : i32
    %c0_i32_0 = arith.constant 0 : i32
    %c0_i32_1 = arith.constant 0 : i32
    return %arg0, %c0_i32, %c0_i32_0 : i32, i32, i32
  }
  func.func @transform_1(%arg0: i32) -> (i32, i32) {
    %c0_i32 = arith.constant 0 : i32
    %c0_i32_0 = arith.constant 0 : i32
    %c0_i32_1 = arith.constant 0 : i32
    return %c0_i32, %c0_i32_0 : i32, i32
  }
  func.func @transform_2(%arg0: i32) -> (i32, i32) {
    %c0_i32 = arith.constant 0 : i32
    %c0_i32_0 = arith.constant 0 : i32
    %c0_i32_1 = arith.constant 0 : i32
    return %c0_i32, %c0_i32_0 : i32, i32
  }
  func.func @transform_3(%arg0: i32) -> (i32, i32, i32) {
    %c0_i32 = arith.constant 0 : i32
    %c0_i32_0 = arith.constant 0 : i32
    %c0_i32_1 = arith.constant 0 : i32
    %c0_i32_2 = arith.constant 0 : i32
    return %c0_i32, %c0_i32_0, %c0_i32_1 : i32, i32, i32
  }
  func.func @transform_4(%arg0: i32) -> (i32, i32) {
    %c0_i32 = arith.constant 0 : i32
    %c0_i32_0 = arith.constant 0 : i32
    %c0_i32_1 = arith.constant 0 : i32
    return %c0_i32, %c0_i32_0 : i32, i32
  }
  func.func @transform_5(%arg0: i32) -> (i32, i32) {
    %c0_i32 = arith.constant 0 : i32
    %c0_i32_0 = arith.constant 0 : i32
    %c0_i32_1 = arith.constant 0 : i32
    return %c0_i32, %c0_i32_0 : i32, i32
  }
  func.func @transform_6(%arg0: i32) -> (i32, i32) {
    %c0_i32 = arith.constant 0 : i32
    %c0_i32_0 = arith.constant 0 : i32
    %c0_i32_1 = arith.constant 0 : i32
    return %c0_i32, %c0_i32_0 : i32, i32
  }
  func.func @transform_7(%arg0: i32) -> (i32, i32) {
    %c0_i32 = arith.constant 0 : i32
    %c0_i32_0 = arith.constant 0 : i32
    %c0_i32_1 = arith.constant 0 : i32
    return %c0_i32, %c0_i32_0 : i32, i32
  }
  func.func @transform_8(%arg0: i32) -> (i32, i32) {
    %c0_i32 = arith.constant 0 : i32
    %c0_i32_0 = arith.constant 0 : i32
    %c0_i32_1 = arith.constant 0 : i32
    return %c0_i32, %c0_i32_0 : i32, i32
  }
  func.func @transform_9(%arg0: i32) -> (i32, i32, i32) {
    %c0_i32 = arith.constant 0 : i32
    %c0_i32_0 = arith.constant 0 : i32
    %c0_i32_1 = arith.constant 0 : i32
    %c0_i32_2 = arith.constant 0 : i32
    return %c0_i32, %c0_i32_0, %c0_i32_1 : i32, i32, i32
  }
  func.func @transform_10(%arg0: i32) -> (i32, i32) {
    %c0_i32 = arith.constant 0 : i32
    %c0_i32_0 = arith.constant 0 : i32
    %c0_i32_1 = arith.constant 0 : i32
    return %c0_i32, %c0_i32_0 : i32, i32
  }
  func.func @transform_11(%arg0: i32) -> (i32, i32, i32) {
    %c0_i32 = arith.constant 0 : i32
    %c0_i32_0 = arith.constant 0 : i32
    %c0_i32_1 = arith.constant 0 : i32
    return %arg0, %c0_i32, %c0_i32_0 : i32, i32, i32
  }
}

</mosaic_0001>

<bundles_post_ra>
// kernel: tpu_custom_call.1
= control target key start
LH: loop header
LB: loop body
LE: loop exit
PB: predicated region body
PF: predicated region fallthrough
CT: control target
= control target key end

     0   :  { %s3819_s0 = inlined_call_operand.vmem [shape: bf16[2,64,32], index: 0, kind: input, shape index: {}]   ;;  %s3820_s1 = inlined_call_operand.vmem [shape: bf16[32,16], index: 1, kind: input, shape index: {}]   ;;  %s3821_s2 = inlined_call_operand.vmem [shape: f32[1,16], index: 2, kind: input, shape index: {}]   ;;  %s3822_s3 = inlined_call_operand.vmem [shape: bf16[9,16,16], index: 3, kind: input, shape index: {}]   ;;  %s3823_s4 = inlined_call_operand.vmem [shape: f32[1,16], index: 4, kind: input, shape index: {}]   ;;  %s3824_s5 = inlined_call_operand.vmem [shape: bf16[16,64], index: 5, kind: input, shape index: {}]   ;;  %s3825_s6 = inlined_call_operand.vmem [shape: f32[1,64], index: 6, kind: input, shape index: {}]   ;;  %s3826_s7 = inlined_call_operand.vmem [shape: bf16[32,64], index: 7, kind: input, shape index: {}]   ;;  %s3827_s8 = inlined_call_operand.vmem [shape: f32[1,64], index: 8, kind: input, shape index: {}]   ;;  %s3828_s9 = inlined_call_operand.hbm [shape: bf16[9,64,64], index: 9, kind: input, shape index: {}]   ;;  %s3829_s10 = inlined_call_operand.vmem [shape: f32[1,64], index: 10, kind: input, shape index: {}]   ;;  %s3830_s11 = inlined_call_operand.hbm [shape: bf16[2,64,64], index: 11, kind: output, shape index: {}]  }
   0x1   :  { %3831 = sst [smem:[#allocation10_spill]] %s3819_s0 }
   0x2   :  { %16 = vsyncpa [#allocation5], 0 }
   0x3   :  { %17 = vsyncpa [#allocation6], 0 }
   0x4   :  { %19 = vsyncpa [#allocation6 + $0x1], 0  ;;  %s3237_s17 = smov 0   ;;  %s3239_s18 = smov 0  }
   0x5   :  { %s3241_s19 = smov 0   ;;  %s3243_s20 = smov 0  }
   0x6 LB: > { %s3258_s21 = sadd.s32 4294967295, %s3169_s20   ;;  %s2607_s22 = sadd.s32 4294967294, %s3169_s20   ;;  %s3169_s20 = sphi %s3243_s20, %s3838_s20   ;;  %s3165_s19 = sphi %s3241_s19, %s3837_s19   ;;  %s3161_s18 = sphi %s3239_s18, %s3836_s18   ;;  %s3157_s17 = sphi %s3237_s17, %s3835_s17  }
   0x7   : > { %s3262_s23 = sadd.s32 1, %s3169_s20   ;;  %s268_s24 = sadd.s32 1, %s3165_s19 }
   0x8   : > { %s265_s25 = ssub.s32 %s3169_s20, %s3262_s23  ;;  %p278_p0 = scmp.ne.s32.totalorder %s3165_s19, %s3161_s18 }
   0x9   : > { %p266_p1 = scmp.eq.s32.totalorder %s265_s25, 0  ;;  %p279_p2 = scmp.eq.s32.totalorder %s3258_s21, 1 }
   0xa   : > { %p284_p3 = scmp.ne.s32.totalorder %s3161_s18, %s3157_s17  ;;  %p285_p4 = scmp.eq.s32.totalorder %s2607_s22, 1 }
   0xb   : > { %s3273_s26 = scalar_select %p266_p1, %s3165_s19, %s268_s24  }
   0xc   : > { %p3275_p5 = por %p279_p2, %p278_p0  ;;  %p3279_p6 = por %p285_p4, %p284_p3 }
   0xd   : > { %p2608_p7 = scmp.ge.s32.totalorder %s3169_s20, 1  ;;  %p292_p8 = scmp.lt.s32.totalorder %s3169_s20, 3 }
   0xe   : > { %p3027_p9 = scmp.eq.s32.totalorder %s3258_s21, 0  ;;  %s327_s12 = sshll.u32 %s3828_s9, 4  ;;  %s328_s12 = int_to_ptr.hbm [resolvable:$true] %s327_s12 }
   0xf   : > { %p293_p10 = pnand %p2608_p7, %p292_p8  ;;  %s3171_s13 = smov [#allocation4]  }
  0x10   : > { %s329_s14 = sshll.u32 %s3171_s13, 4  ;;  %s3172_s15 = smov 64   ;;  %s330_s14 = int_to_ptr.vmem [resolvable:$true] %s329_s14 }
  0x11   : > { %p3019_p11 = pneg %p293_p10  ;;  %s3173_s16 = smov 4  }
  0x12   : > { %356 = sbr.rel (%p293_p10) target bundleno = 1028 (0x404), region = 64 }
  0x13   : > { %p3020_p12 = pnand %p3027_p9, %p3019_p11 }
  0x15   : > { %3022 = dma.hbm_to_vmem [thread:$0]  (!%p3020_p12), %s328_s12, 4608, %s330_s14, [#allocation5], %s3172_s15, %s3172_s15, %s3173_s16  }
  0x17   : > { %3148 = dma.done.wait (%p3027_p9), [#allocation5], 4608  }
  0x18   : > { %3150 = vsyncadd (%p3027_p9), [#allocation5], 4294962688  ;;  %vm501_vm0 = vcmask 130048   ;;  %p397_p13 = scmp.lt.s32.totalorder %s3258_s21, 1  ;;  %vm1440_vm1 = vcmask 523264   ;;  %v3174_v0 = vmov 0.0  }
  0x19   : > { %502 = vst.msk [vmem:[#allocation2] sm:$0xff] %vm501_vm0, %v3174_v0  ;;  %v2961_v1 = vld [vmem:[%s3820_s1 + $0x8] sm:$0xff]  ;;  %v2960_v2 = vld [vmem:[%s3820_s1] sm:$0xff]  ;;  %s3834_s0 = sld [smem:[#allocation10_spill]]  ;;  %vm451_vm2 = vcmask 261120   ;;  %v2965_v10 = vld [vmem:[%s3822_s3 + $0x18] sm:$0xff] }
  0x1a   : > { %s398_s22 = scalar_select %p397_p13, %s3258_s21, 1  ;;  %503 = vst.msk [vmem:[#allocation2 + $0x8] sm:$0xff] %vm501_vm0, %v3174_v0  ;;  %470 = vmatpush.bf16.msra.mxu0 %v2961_v1  ;;  %v2963_v7 = vld [vmem:[%s3822_s3 + $0x8] sm:$0xff]  ;;  %v2962_v8 = vld [vmem:[%s3822_s3] sm:$0xff]  ;;  %v2964_v27 = vld [vmem:[%s3822_s3 + $0x10] sm:$0xff]  ;;  %vm1313_vm3 = vcmask 1043456  }
  0x1b   : > { %504 = vst.msk [vmem:[#allocation2 + $0x10] sm:$0xff] %vm501_vm0, %v3174_v0  ;;  %588 = vmatpush.bf16.msra.mxu1 %v2963_v7  ;;  %3011 = vmatpush.bf16.msra.mxu2 %v2962_v8  ;;  %v2966_v9 = vld [vmem:[%s3822_s3 + $0x20] sm:$0xff]  ;;  %v2967_v33 = vld [vmem:[%s3822_s3 + $0x28] sm:$0xff]  ;;  %s394_s29 = sand.u32 1, %s3161_s18   ;;  %vm2508_vm4 = vcmask 519168   ;;  %s3010_s13 = sshll.u32 %s3258_s21, 5 }
  0x1c   : > { %s2955_s24 = sshll.u32 %s398_s22, 5  ;;  %505 = vst.msk [vmem:[#allocation2 + $0x18] sm:$0xff] %vm501_vm0, %v3174_v0  ;;  %3012 = vmatpush.bf16.msra.mxu3 %v2962_v8  ;;  %v3363_v11 = vld [vmem:[%s3821_s2] ss:$0 sm:$0xff]  ;;  %s2613_s30 = sshll.u32 %s394_s29, 5 }
  0x1d   : > { %506 = vst.msk [vmem:[#allocation2 + $0x20] sm:$0xff] %vm501_vm0, %v3174_v0  ;;  %s3754_s12 = scalar_lea.vmem [#allocation7], %s2613_s30  ;;  %s2529_s16 = scalar_lea.hbm %s3830_s11, %s3010_s13 }
  0x1e   : > { %507 = vst.msk [vmem:[#allocation2 + $0x28] sm:$0xff] %vm501_vm0, %v3174_v0  ;;  %471 = vmatpush.bf16.msra.mxu0 %v2960_v2  ;;  %s2530_s22 = sshll.u32 %s3754_s12, 4  ;;  %s2518_s21 = scalar_lea.sflag [#allocation6], %s394_s29  ;;  %s2531_s22 = int_to_ptr.vmem [resolvable:$true] %s2530_s22 }
  0x1f   : > { %s401_s15 = scalar_lea.vmem %s3834_s0, %s2955_s24  ;;  %508 = vst.msk [vmem:[#allocation2 + $0x30] sm:$0xff] %vm501_vm0, %v3174_v0  ;;  %882 = vmatpush.bf16.msrb.mxu1 %v2966_v9  ;;  %965 = vmatpush.bf16.msrb.mxu2 %v2967_v33  ;;  %s2532_s24 = sshll.u32 %s2529_s16, 4  ;;  %s2533_s24 = int_to_ptr.hbm [resolvable:$true] %s2532_s24 }
  0x20   : > { %509 = vst.msk [vmem:[#allocation2 + $0x38] sm:$0xff] %vm501_vm0, %v3174_v0  ;;  %v3314_v3 = vld [vmem:[%s401_s15] sm:$0xff]  ;;  %v3334_v4 = vld [vmem:[%s401_s15 + $0x8] sm:$0xff]  ;;  %v3340_v5 = vld [vmem:[%s401_s15 + $0x10] sm:$0xff]  ;;  %716 = vmatpush.bf16.msrb.mxu3 %v2964_v27  ;;  %s3117_s25 = sshra.s32 %s2533_s24, 4  ;;  %s3118_s25 = int_to_ptr.hbm [resolvable:$true] %s3117_s25 }
  0x21   : > { %510 = vst.msk [vmem:[#allocation2 + $0x40] sm:$0xff] %vm501_vm0, %v3174_v0  ;;  %2640 = vmatmul.msk.bf16.vlgmr.msra.gmra.mxu0 %vm451_vm2, %v3314_v3  ;;  %v3344_v6 = vld [vmem:[%s401_s15 + $0x18] sm:$0xff]  ;;  %v542_v17 = vld [vmem:[#allocation2 + $0x1] sm:$0xff]  ;;  %s3119_s30 = scalar_lea.hbm %s3118_s25, 32  ;;  %s3123_s15 = scalar_lea.hbm %s3830_s11, 64 }
  0x22   : > { %511 = vst.msk [vmem:[#allocation2 + $0x48] sm:$0xff] %vm501_vm0, %v3174_v0  ;;  %643 = vmatpush.bf16.msrb.mxu0 %v2962_v8  ;;  %v525_v18 = vld [vmem:[#allocation2] sm:$0xff]  ;;  %p3120_p0 = scmp.ne.s32.totalorder %s3118_s25, %s3119_s30  ;;  %p3124_p3 = scmp.lt.s32.totalorder %s3118_s25, %s3830_s11 }
  0x23   : > { %512 = vst.msk [vmem:[#allocation2 + $0x50] sm:$0xff] %vm501_vm0, %v3174_v0  ;;  %p3125_p4 = scmp.lt.s32.totalorder %s3123_s15, %s3119_s30 }
  0x24   : > { %513 = vst.msk [vmem:[#allocation2 + $0x58] sm:$0xff] %vm501_vm0, %v3174_v0  ;;  %p3121_p1 = pnand %p3120_p0, %p3275_p5 }
  0x25   : > { %514 = vst.msk [vmem:[#allocation2 + $0x60] sm:$0xff] %vm501_vm0, %v3174_v0  ;;  %p3126_p7 = por %p3125_p4, %p3124_p3 }
  0x26   : > { %1441 = vst.msk [vmem:[#allocation3] sm:$0xff] %vm1440_vm1, %v3174_v0  ;;  %799 = vmatpush.bf16.msra.mxu0 %v2965_v10  ;;  %p3122_p2 = pneg %p3121_p1 }
  0x27   : > { %1442 = vst.msk [vmem:[#allocation3 + $0x8] sm:$0xff] %vm1440_vm1, %v3174_v0 }
  0x28   : > { %1443 = vst.msk [vmem:[#allocation3 + $0x10] sm:$0xff] %vm1440_vm1, %v3174_v0  ;;  %p3127_p8 = pnand %p3126_p7, %p3122_p2 }
  0x29   : > { %1444 = vst.msk [vmem:[#allocation3 + $0x18] sm:$0xff] %vm1440_vm1, %v3174_v0 }
  0x2a   : > { %1445 = vst.msk [vmem:[#allocation3 + $0x20] sm:$0xff] %vm1440_vm1, %v3174_v0 }
  0x2b   : > { %1446 = vst.msk [vmem:[#allocation3 + $0x28] sm:$0xff] %vm1440_vm1, %v3174_v0 }
  0x2c   : > { %1447 = vst.msk [vmem:[#allocation3 + $0x30] sm:$0xff] %vm1440_vm1, %v3174_v0 }
  0x2d   : > { %1448 = vst.msk [vmem:[#allocation3 + $0x38] sm:$0xff] %vm1440_vm1, %v3174_v0 }
  0x2e   : > { %1449 = vst.msk [vmem:[#allocation3 + $0x40] sm:$0xff] %vm1440_vm1, %v3174_v0 }
  0x2f   : > { %1450 = vst.msk [vmem:[#allocation3 + $0x48] sm:$0xff] %vm1440_vm1, %v3174_v0 }
  0x30   : > { %1451 = vst.msk [vmem:[#allocation3 + $0x50] sm:$0xff] %vm1440_vm1, %v3174_v0 }
  0x31   : > { %1452 = vst.msk [vmem:[#allocation3 + $0x58] sm:$0xff] %vm1440_vm1, %v3174_v0  ;;  %2641 = vmatmul.msk.bf16.gmra.mxu0 %vm451_vm2, %v3334_v4 }
  0x32   : > { %1453 = vst.msk [vmem:[#allocation3 + $0x60] sm:$0xff] %vm1440_vm1, %v3174_v0 }
  0x41   : > { %2642 = vmatmul.msk.bf16.gmra.mxu0 %vm451_vm2, %v3340_v5 }
  0x51   : > { %2643 = vmatmul.msk.bf16.gmra.mxu0 %vm451_vm2, %v3344_v6 }
  0x9e   : > { %v473_v12 = vpop.f32.mrf.mxu0 }
  0x9f   : > { %v474_v13 = vadd.f32 %v3363_v11, %v473_v12  ;;  %v2968_v12 = vld [vmem:[%s3822_s3 + $0x30] sm:$0xff] }
  0xa1   : > { %v493_v14 = vmax.f32 %v474_v13, 0.0 }
  0xa3   : > { %517 = vst.msk [vmem:[#allocation2 + $0xb] sm:$0xff] %vm501_vm0, %v493_v14 }
  0xa6   : > { %v475_v15 = vpop.f32.mrf.mxu0 }
  0xa7   : > { %v476_v16 = vadd.f32 %v3363_v11, %v475_v15 }
  0xa9   : > { %v494_v19 = vmax.f32 %v476_v16, 0.0 }
  0xaa   : > { %v543_v20 = vld [vmem:[#allocation2 + $0x9] sm:$0xff] }
  0xab   : > { %v526_v21 = vld [vmem:[#allocation2 + $0x8] sm:$0xff]  ;;  %518 = vst.msk [vmem:[#allocation2 + $0x15] sm:$0xff] %vm501_vm0, %v494_v19  ;;  %v552_v22 = vpack.c.bf16 %v543_v20, %v542_v17 }
  0xac   : > { %v535_v23 = vpack.c.bf16 %v526_v21, %v525_v18  ;;  %v3383_v39 = vld [vmem:[#allocation2 + $0xa] sm:$0xff] }
  0xad   : > { %2650 = vmatmul.msk.bf16.vlgmr.msra.gmra.mxu1 %vm501_vm0, %v552_v22  ;;  %v919_v19 = vld [vmem:[#allocation2 + $0xc] sm:$0xff] }
  0xae   : > { %2659 = vmatmul.msk.bf16.vlgmr.msrb.gmra.mxu0 %vm501_vm0, %v535_v23  ;;  %v478_v24 = vpop.f32.mrf.mxu0 }
  0xaf   : > { %v479_v25 = vadd.f32 %v3363_v11, %v478_v24  ;;  %v2970_v24 = vld [vmem:[%s3822_s3 + $0x40] sm:$0xff] }
  0xb0   : > { %1214 = vmatpush.bf16.msra.mxu1 %v2970_v24 }
  0xb1   : > { %v495_v26 = vmax.f32 %v479_v25, 0.0 }
  0xb2   : > { %v544_v31 = vld [vmem:[#allocation2 + $0x11] sm:$0xff] }
  0xb3   : > { %519 = vst.msk [vmem:[#allocation2 + $0x1f] sm:$0xff] %vm501_vm0, %v495_v26  ;;  %v3377_v32 = vld [vmem:[#allocation2 + $0x12] sm:$0xff] }
  0xb4   : > { %v527_v35 = vld [vmem:[#allocation2 + $0x10] sm:$0xff]  ;;  %v763_v42 = vpack.c.bf16 %v3377_v32, %v3383_v39 }
  0xb5   : > { %v3385_v40 = vld [vmem:[#allocation2 + $0x14] sm:$0xff] }
  0xb6   : > { %v480_v28 = vpop.f32.mrf.mxu0  ;;  %v929_v22 = vpack.c.bf16 %v3385_v40, %v919_v19 }
  0xb7   : > { %v481_v29 = vadd.f32 %v3363_v11, %v480_v28 }
  0xb9   : > { %v496_v30 = vmax.f32 %v481_v29, 0.0 }
  0xba   : > { %v545_v34 = vld [vmem:[#allocation2 + $0x19] sm:$0xff]  ;;  %v546_v53 = vld [vmem:[#allocation2 + $0x21] sm:$0xff] }
  0xbb   : > { %v528_v36 = vld [vmem:[#allocation2 + $0x18] sm:$0xff]  ;;  %520 = vst.msk [vmem:[#allocation2 + $0x29] sm:$0xff] %vm501_vm0, %v496_v30  ;;  %v553_v37 = vpack.c.bf16 %v545_v34, %v544_v31  ;;  %v529_v54 = vld [vmem:[#allocation2 + $0x20] sm:$0xff] }
  0xbc   : > { %v536_v38 = vpack.c.bf16 %v528_v36, %v527_v35  ;;  %v3387_v41 = vld [vmem:[#allocation2 + $0x1c] sm:$0xff] }
  0xbd   : > { %v1012_v43 = vpack.c.bf16 %v3387_v41, %v3385_v40  ;;  %2651 = vmatmul.msk.bf16.gmra.mxu1 %vm501_vm0, %v553_v37  ;;  %v3402_v57 = vld [vmem:[#allocation2 + $0x1a] sm:$0xff] }
  0xbe   : > { %2660 = vmatmul.msk.bf16.vlgmr.msra.gmra.mxu2 %vm501_vm0, %v536_v38  ;;  %2681 = vmatmul.msk.bf16.vlgmr.msra.gmra.mxu0 %vm501_vm0, %v763_v42  ;;  %v483_v44 = vpop.f32.mrf.mxu0  ;;  %v670_v42 = vld [vmem:[#allocation2 + $0x2] sm:$0xff] }
  0xbf   : > { %v484_v45 = vadd.f32 %v3363_v11, %v483_v44  ;;  %v680_v44 = vpack.c.bf16 %v3383_v39, %v670_v42  ;;  %v681_v39 = vpack.c.bf16 %v3402_v57, %v3377_v32  ;;  %v1094_v42 = vld [vmem:[#allocation2 + $0x5d] sm:$0xff] }
  0xc1   : > { %v497_v46 = vmax.f32 %v484_v45, 0.0  ;;  %v837_v45 = vld [vmem:[#allocation2 + $0x13] sm:$0xff] }
  0xc2   : > { %v547_v49 = vld [vmem:[#allocation2 + $0x29] sm:$0xff] }
  0xc3   : > { %521 = vst.msk [vmem:[#allocation2 + $0x33] sm:$0xff] %vm501_vm0, %v497_v46  ;;  %v530_v50 = vld [vmem:[#allocation2 + $0x28] sm:$0xff]  ;;  %v554_v55 = vpack.c.bf16 %v547_v49, %v546_v53 }
  0xc4   : > { %v3399_v52 = vld [vmem:[#allocation2 + $0x22] sm:$0xff]  ;;  %v537_v56 = vpack.c.bf16 %v530_v50, %v529_v54  ;;  %v757_v21 = vld [vmem:[#allocation2 + $0x2a] sm:$0xff] }
  0xc5   : > { %v3404_v58 = vld [vmem:[#allocation2 + $0x24] sm:$0xff]  ;;  %v764_v60 = vpack.c.bf16 %v3399_v52, %v3402_v57 }
  0xc6   : > { %v485_v47 = vpop.f32.mrf.mxu0  ;;  %v930_v37 = vpack.c.bf16 %v3404_v58, %v3387_v41  ;;  %v839_v53 = vld [vmem:[#allocation2 + $0x23] sm:$0xff] }
  0xc7   : > { %v486_v48 = vadd.f32 %v3363_v11, %v485_v47  ;;  %v1086_v54 = vld [vmem:[#allocation2 + $0x1d] sm:$0xff] }
  0xc9   : > { %v498_v51 = vmax.f32 %v486_v48, 0.0  ;;  %v836_v48 = vld [vmem:[#allocation2 + $0xb] sm:$0xff] }
  0xca   : > { %v3406_v59 = vld [vmem:[#allocation2 + $0x2c] sm:$0xff]  ;;  %v3417_v8 = vld [vmem:[#allocation2 + $0x34] sm:$0xff]  ;;  %v846_v49 = vpack.c.bf16 %v837_v45, %v836_v48 }
  0xcb   : > { %522 = vst.msk [vmem:[#allocation2 + $0x3d] sm:$0xff] %vm501_vm0, %v498_v51  ;;  %v1013_v61 = vpack.c.bf16 %v3406_v59, %v3404_v58  ;;  %v531_v1 = vld [vmem:[#allocation2 + $0x30] sm:$0xff]  ;;  %v931_v50 = vpack.c.bf16 %v3417_v8, %v3406_v59 }
  0xcc   : > { %v3428_v17 = vld [vmem:[#allocation2 + $0x32] sm:$0xff] }
  0xcd   : > { %2652 = vmatmul.msk.bf16.gmra.mxu1 %vm501_vm0, %v554_v55  ;;  %v548_v18 = vld [vmem:[#allocation2 + $0x31] sm:$0xff]  ;;  %v765_v23 = vpack.c.bf16 %v3428_v17, %v757_v21  ;;  %v838_v55 = vld [vmem:[#allocation2 + $0x1b] sm:$0xff] }
  0xce   : > { %2661 = vmatmul.msk.bf16.gmra.mxu2 %vm501_vm0, %v537_v56  ;;  %2682 = vmatmul.msk.bf16.gmra.mxu0 %vm501_vm0, %v764_v60  ;;  %v488_v62 = vpop.f32.mrf.mxu0  ;;  %v847_v56 = vpack.c.bf16 %v839_v53, %v838_v55  ;;  %v841_v32 = vld [vmem:[#allocation2 + $0x33] sm:$0xff] }
  0xcf   : > { %v489_v63 = vadd.f32 %v3363_v11, %v488_v62  ;;  %v1085_v62 = vld [vmem:[#allocation2 + $0x15] sm:$0xff] }
  0xd0   : > { %v1171_v41 = vld [vmem:[#allocation2 + $0x2e] sm:$0xff] }
  0xd1   : > { %v499_v0 = vmax.f32 %v489_v63, 0.0  ;;  %v1095_v63 = vpack.c.bf16 %v1086_v54, %v1085_v62 }
  0xd2   : > { %v532_v2 = vld [vmem:[#allocation2 + $0x38] sm:$0xff] }
  0xd3   : > { %523 = vst.msk [vmem:[#allocation2 + $0x47] sm:$0xff] %vm501_vm0, %v499_v0  ;;  %v538_v7 = vpack.c.bf16 %v532_v2, %v531_v1  ;;  %v3419_v9 = vld [vmem:[#allocation2 + $0x3c] sm:$0xff]  ;;  %v682_v0 = vpack.c.bf16 %v757_v21, %v3399_v52  ;;  %v1088_v1 = vld [vmem:[#allocation2 + $0x2d] sm:$0xff] }
  0xd4   : > { %v1014_v10 = vpack.c.bf16 %v3419_v9, %v3417_v8  ;;  %v549_v15 = vld [vmem:[#allocation2 + $0x39] sm:$0xff]  ;;  %v840_v2 = vld [vmem:[#allocation2 + $0x2b] sm:$0xff] }
  0xd5   : > { %2662 = vmatmul.msk.bf16.vlgmr.msra.gmra.mxu3 %vm501_vm0, %v538_v7  ;;  %v555_v20 = vpack.c.bf16 %v549_v15, %v548_v18  ;;  %v759_v36 = vld [vmem:[#allocation2 + $0x3a] sm:$0xff]  ;;  %v848_v7 = vpack.c.bf16 %v841_v32, %v840_v2 }
  0xd6   : > { %v490_v13 = vpop.f32.mrf.mxu0  ;;  %1048 = vmatpush.bf16.msra.mxu3 %v2968_v12  ;;  %v683_v52 = vpack.c.bf16 %v759_v36, %v3428_v17 }
  0xd7   : > { %v491_v14 = vadd.f32 %v3363_v11, %v490_v13  ;;  %v2969_v11 = vld [vmem:[%s3822_s3 + $0x38] sm:$0xff]  ;;  %v1087_v13 = vld [vmem:[#allocation2 + $0x25] sm:$0xff] }
  0xd8   : > { %1131 = vmatpush.bf16.msrb.mxu0 %v2969_v11 }
  0xd9   : > { %v500_v16 = vmax.f32 %v491_v14, 0.0  ;;  %v1096_v14 = vpack.c.bf16 %v1088_v1, %v1087_v13 }
  0xda   : > { %v533_v25 = vld [vmem:[#allocation2 + $0x40] sm:$0xff]  ;;  %v534_v26 = vld [vmem:[#allocation2 + $0x48] sm:$0xff] }
  0xdb   : > { %524 = vst.msk [vmem:[#allocation2 + $0x51] sm:$0xff] %vm501_vm0, %v500_v16  ;;  %v3442_v27 = vld [vmem:[#allocation2 + $0x44] sm:$0xff]  ;;  %v539_v29 = vpack.c.bf16 %v534_v26, %v533_v25 }
  0xdc   : > { %v550_v31 = vld [vmem:[#allocation2 + $0x41] sm:$0xff]  ;;  %v551_v33 = vld [vmem:[#allocation2 + $0x49] sm:$0xff]  ;;  %v932_v60 = vpack.c.bf16 %v3442_v27, %v3419_v9 }
  0xdd   : > { %2653 = vmatmul.msk.bf16.gmra.mxu1 %vm501_vm0, %v555_v20  ;;  %v760_v34 = vld [vmem:[#allocation2 + $0x42] sm:$0xff]  ;;  %v556_v35 = vpack.c.bf16 %v551_v33, %v550_v31 }
  0xde   : > { %2703 = vmatmul.msk.bf16.vlgmr.msrb.gmra.mxu2 %vm501_vm0, %v929_v22  ;;  %2683 = vmatmul.msk.bf16.gmra.mxu0 %vm501_vm0, %v765_v23  ;;  %v766_v38 = vpack.c.bf16 %v760_v34, %v759_v36  ;;  %v843_v15 = vld [vmem:[#allocation2 + $0x43] sm:$0xff]  ;;  %v842_v20 = vld [vmem:[#allocation2 + $0x3b] sm:$0xff] }
  0xdf   : > { %v1090_v16 = vld [vmem:[#allocation2 + $0x3d] sm:$0xff]  ;;  %v849_v22 = vpack.c.bf16 %v843_v15, %v842_v20  ;;  %v1089_v23 = vld [vmem:[#allocation2 + $0x35] sm:$0xff]  ;;  %v1174_v9 = vld [vmem:[#allocation2 + $0x46] sm:$0xff] }
  0xe0   : > { %v1097_v11 = vpack.c.bf16 %v1090_v16, %v1089_v23  ;;  %v2971_v16 = vld [vmem:[%s3824_s5] sm:$0xff] }
  0xe1   : > { %1353 = vmatpush.bf16.msra.mxu2 %v2971_v16 }
  0xe2   : > { %v3444_v28 = vld [vmem:[#allocation2 + $0x4c] sm:$0xff]  ;;  %v3471_v57 = vld [vmem:[#allocation2 + $0x54] sm:$0xff] }
  0xe3   : > { %v1015_v30 = vpack.c.bf16 %v3444_v28, %v3442_v27  ;;  %v761_v46 = vld [vmem:[#allocation2 + $0x4a] sm:$0xff]  ;;  %v762_v47 = vld [vmem:[#allocation2 + $0x52] sm:$0xff]  ;;  %v933_v12 = vpack.c.bf16 %v3471_v57, %v3444_v28 }
  0xe4   : > { %v767_v51 = vpack.c.bf16 %v762_v47, %v761_v46  ;;  %v684_v25 = vpack.c.bf16 %v761_v46, %v760_v34  ;;  %v844_v17 = vld [vmem:[#allocation2 + $0x4b] sm:$0xff]  ;;  %v845_v26 = vld [vmem:[#allocation2 + $0x53] sm:$0xff]  ;;  %v1169_v34 = vld [vmem:[#allocation2 + $0x1e] sm:$0xff] }
  0xe5   : > { %2663 = vmatmul.msk.bf16.gmra.mxu3 %vm501_vm0, %v539_v29  ;;  %v1091_v29 = vld [vmem:[#allocation2 + $0x45] sm:$0xff]  ;;  %v1092_v31 = vld [vmem:[#allocation2 + $0x4d] sm:$0xff]  ;;  %v1168_v46 = vld [vmem:[#allocation2 + $0x16] sm:$0xff] }
  0xe6   : > { %v1098_v36 = vpack.c.bf16 %v1092_v31, %v1091_v29  ;;  %v1178_v47 = vpack.c.bf16 %v1169_v34, %v1168_v46  ;;  %v2973_v27 = vld [vmem:[%s3826_s7 + $0x8] sm:$0xff] }
  0xed   : > { %2654 = vmatmul.msk.bf16.gmra.mxu1 %vm501_vm0, %v556_v35  ;;  %v850_v35 = vpack.c.bf16 %v845_v26, %v844_v17 }
  0xee   : > { %2704 = vmatmul.msk.bf16.gmra.mxu2 %vm501_vm0, %v930_v37  ;;  %2684 = vmatmul.msk.bf16.gmra.mxu0 %vm501_vm0, %v766_v38  ;;  %v1093_v38 = vld [vmem:[#allocation2 + $0x55] sm:$0xff] }
  0xef   : > { %v1099_v48 = vpack.c.bf16 %v1094_v42, %v1093_v38 }
  0xf5   : > { %2670 = vmatmul.msk.bf16.vlgmr.msrb.gmra.mxu3 %vm501_vm0, %v680_v44 }
  0xf6   : > { %1401 = vmatpush.bf16.msrb.mxu3 %v2973_v27 }
  0xfd   : > { %2692 = vmatmul.msk.bf16.vlgmr.msrb.gmra.mxu1 %vm501_vm0, %v846_v49 }
  0xfe   : > { %2705 = vmatmul.msk.bf16.gmra.mxu2 %vm501_vm0, %v931_v50  ;;  %2685 = vmatmul.msk.bf16.gmra.mxu0 %vm501_vm0, %v767_v51  ;;  %v1170_v51 = vld [vmem:[#allocation2 + $0x26] sm:$0xff] }
  0xff   : > { %v1179_v53 = vpack.c.bf16 %v1171_v41, %v1170_v51 }
 0x105   : > { %2671 = vmatmul.msk.bf16.gmra.mxu3 %vm501_vm0, %v681_v39 }
 0x10d   : > { %2693 = vmatmul.msk.bf16.gmra.mxu1 %vm501_vm0, %v847_v56 }
 0x10e   : > { %2706 = vmatmul.msk.bf16.gmra.mxu2 %vm501_vm0, %v932_v60  ;;  %2725 = vmatmul.msk.bf16.vlgmr.msrb.gmra.mxu0 %vm501_vm0, %v1095_v63  ;;  %v1173_v60 = vld [vmem:[#allocation2 + $0x3e] sm:$0xff] }
 0x115   : > { %2672 = vmatmul.msk.bf16.gmra.mxu3 %vm501_vm0, %v682_v0 }
 0x11d   : > { %2694 = vmatmul.msk.bf16.gmra.mxu1 %vm501_vm0, %v848_v7 }
 0x11e   : > { %2707 = vmatmul.msk.bf16.gmra.mxu2 %vm501_vm0, %v933_v12  ;;  %2726 = vmatmul.msk.bf16.gmra.mxu0 %vm501_vm0, %v1096_v14 }
 0x125   : > { %2673 = vmatmul.msk.bf16.gmra.mxu3 %vm501_vm0, %v683_v52 }
 0x12a   : > { %v590_v18 = vpop.f32.mrf.mxu1 }
 0x12b   : > { %v645_v19 = vpop.f32.mrf.mxu0 }
 0x12c   : > { %v646_v21 = vadd.f32 %v645_v19, %v590_v18  ;;  %v1011_v18 = vld [vmem:[#allocation2 + $0x5c] sm:$0xff] }
 0x12d   : > { %2695 = vmatmul.msk.bf16.gmra.mxu1 %vm501_vm0, %v849_v22  ;;  %v1016_v20 = vpack.c.bf16 %v1011_v18, %v3471_v57 }
 0x12e   : > { %2727 = vmatmul.msk.bf16.gmra.mxu0 %vm501_vm0, %v1097_v11  ;;  %v1176_v11 = vld [vmem:[#allocation2 + $0x56] sm:$0xff] }
 0x132   : > { %v3482_v24 = vpop.f32.mrf.mxu1 }
 0x133   : > { %v3495_v44 = vpop.f32.mrf.mxu0 }
 0x135   : > { %2674 = vmatmul.msk.bf16.gmra.mxu3 %vm501_vm0, %v684_v25  ;;  %v1177_v25 = vld [vmem:[#allocation2 + $0x5e] sm:$0xff] }
 0x13a   : > { %v3485_v33 = vpop.f32.mrf.mxu1 }
 0x13b   : > { %v801_v50 = vpop.f32.mrf.mxu0 }
 0x13d   : > { %2696 = vmatmul.msk.bf16.gmra.mxu1 %vm501_vm0, %v850_v35  ;;  %v1182_v35 = vpack.c.bf16 %v1177_v25, %v1176_v11 }
 0x13e   : > { %2728 = vmatmul.msk.bf16.gmra.mxu0 %vm501_vm0, %v1098_v36 }
 0x141   : > { %v650_v28 = vpop.f32.mrf.mxu2 }
 0x142   : > { %v3489_v37 = vpop.f32.mrf.mxu1  ;;  %v651_v22 = vadd.f32 %v650_v28, %v3485_v33  ;;  %v648_v28 = vadd.f32 %v3495_v44, %v3482_v24 }
 0x143   : > { %v3510_v54 = vpop.f32.mrf.mxu0 }
 0x145   : > { %2714 = vmatmul.msk.bf16.vlgmr.msra.gmra.mxu3 %vm501_vm0, %v1012_v43 }
 0x149   : > { %v652_v26 = vpop.f32.mrf.mxu2 }
 0x14a   : > { %v3497_v45 = vpop.f32.mrf.mxu1 }
 0x14b   : > { %v806_v58 = vpop.f32.mrf.mxu0 }
 0x14d   : > { %2736 = vmatmul.msk.bf16.vlgmr.msra.gmra.mxu1 %vm501_vm0, %v1178_v47 }
 0x14e   : > { %2729 = vmatmul.msk.bf16.gmra.mxu0 %vm501_vm0, %v1099_v48 }
 0x151   : > { %v655_v42 = vpop.f32.mrf.mxu2 }
 0x152   : > { %v3501_v49 = vpop.f32.mrf.mxu1  ;;  %v656_v46 = vadd.f32 %v655_v42, %v3497_v45 }
 0x153   : > { %v3525_v1 = vpop.f32.mrf.mxu0 }
 0x155   : > { %2715 = vmatmul.msk.bf16.gmra.mxu3 %vm501_vm0, %v1013_v61  ;;  %v1172_v61 = vld [vmem:[#allocation2 + $0x36] sm:$0xff] }
 0x156   : > { %v1180_v0 = vpack.c.bf16 %v1173_v60, %v1172_v61 }
 0x158   : > { %v660_v40 = vpop.f32.mrf.mxu3 }
 0x159   : > { %v3565_v61 = vpop.f32.mrf.mxu2 }
 0x15a   : > { %v605_v43 = vpop.f32.mrf.mxu1 }
 0x15b   : > { %v3507_v39 = vadd.f32 %v660_v40, %v605_v43  ;;  %v811_v52 = vpop.f32.mrf.mxu0 }
 0x15d   : > { %2737 = vmatmul.msk.bf16.gmra.mxu1 %vm501_vm0, %v1179_v53 }
 0x160   : > { %v3512_v55 = vpop.f32.mrf.mxu3 }
 0x162   : > { %v3514_v56 = vpop.f32.mrf.mxu1 }
 0x165   : > { %2716 = vmatmul.msk.bf16.gmra.mxu3 %vm501_vm0, %v1014_v10  ;;  %v1175_v10 = vld [vmem:[#allocation2 + $0x4e] sm:$0xff] }
 0x166   : > { %v1181_v14 = vpack.c.bf16 %v1175_v10, %v1174_v9 }
 0x168   : > { %v665_v59 = vpop.f32.mrf.mxu3 }
 0x16a   : > { %v610_v62 = vpop.f32.mrf.mxu1 }
 0x16b   : > { %v3520_v63 = vadd.f32 %v665_v59, %v610_v62 }
 0x16d   : > { %2738 = vmatmul.msk.bf16.gmra.mxu1 %vm501_vm0, %v1180_v0 }
 0x170   : > { %v3523_v32 = vpop.f32.mrf.mxu3 }
 0x172   : > { %v3527_v2 = vpop.f32.mrf.mxu1 }
 0x175   : > { %2717 = vmatmul.msk.bf16.gmra.mxu3 %vm501_vm0, %v1015_v30 }
 0x178   : > { %v718_v8 = vpop.f32.mrf.mxu3 }
 0x179   : > { %v743_v7 = vadd.f32 %v718_v8, %v646_v21  ;;  %v3544_v21 = vpop.f32.mrf.mxu0 }
 0x17a   : > { %v884_v12 = vpop.f32.mrf.mxu1 }
 0x17b   : > { %v826_v13 = vadd.f32 %v801_v50, %v743_v7  ;;  %v967_v7 = vpop.f32.mrf.mxu2 }
 0x17d   : > { %v3533_v15 = vadd.f32 %v884_v12, %v826_v13  ;;  %2739 = vmatmul.msk.bf16.gmra.mxu1 %vm501_vm0, %v1181_v14 }
 0x180   : > { %v720_v30 = vpop.f32.mrf.mxu3 }
 0x181   : > { %v816_v34 = vpop.f32.mrf.mxu0 }
 0x182   : > { %v886_v19 = vpop.f32.mrf.mxu1 }
 0x183   : > { %v969_v16 = vpop.f32.mrf.mxu2 }
 0x185   : > { %2718 = vmatmul.msk.bf16.gmra.mxu3 %vm501_vm0, %v1016_v20 }
 0x188   : > { %v723_v23 = vpop.f32.mrf.mxu3 }
 0x189   : > { %v745_v17 = vadd.f32 %v723_v23, %v651_v22  ;;  %v3553_v48 = vpop.f32.mrf.mxu0  ;;  %v744_v22 = vadd.f32 %v720_v30, %v648_v28  ;;  %v992_v30 = vadd.f32 %v967_v7, %v3533_v15 }
 0x18a   : > { %v889_v29 = vpop.f32.mrf.mxu1 }
 0x18b   : > { %v828_v31 = vadd.f32 %v806_v58, %v745_v17  ;;  %v2972_v58 = vld [vmem:[%s3826_s7] sm:$0xff]  ;;  %v827_v23 = vadd.f32 %v3510_v54, %v744_v22 }
 0x18c   : > { %1402 = vmatpush.bf16.msrb.mxu3 %v2972_v58 }
 0x18d   : > { %v3547_v36 = vadd.f32 %v889_v29, %v828_v31  ;;  %2740 = vmatmul.msk.bf16.gmra.mxu1 %vm501_vm0, %v1182_v35  ;;  %v653_v35 = vadd.f32 %v652_v26, %v3489_v37 }
 0x190   : > { %v725_v57 = vpop.f32.mrf.mxu3 }
 0x191   : > { %v821_v53 = vpop.f32.mrf.mxu0  ;;  %v746_v42 = vadd.f32 %v725_v57, %v653_v35 }
 0x192   : > { %v3550_v38 = vpop.f32.mrf.mxu1 }
 0x195   : > { %2757 = vmatmul.msk.bf16.vlgmr.msrb.gmra.mxu3 %vm451_vm2, %v3314_v3 }
 0x198   : > { %v728_v33 = vpop.f32.mrf.mxu3 }
 0x199   : > { %v747_v47 = vadd.f32 %v728_v33, %v656_v46  ;;  %v3571_v8 = vpop.f32.mrf.mxu0 }
 0x19a   : > { %v894_v50 = vpop.f32.mrf.mxu1 }
 0x19b   : > { %v830_v40 = vadd.f32 %v811_v52, %v747_v47 }
 0x19d   : > { %v3555_v41 = vadd.f32 %v894_v50, %v830_v40  ;;  %v829_v50 = vadd.f32 %v3525_v1, %v746_v42 }
 0x19f   : > { %v912_v15 = vadd.f32 %v3550_v38, %v829_v50 }
 0x1a0   : > { %v3557_v43 = vpop.f32.mrf.mxu3 }
 0x1a1   : > { %v1133_v12 = vpop.f32.mrf.mxu0 }
 0x1a2   : > { %v3559_v51 = vpop.f32.mrf.mxu1 }
 0x1a5   : > { %2758 = vmatmul.msk.bf16.gmra.mxu3 %vm451_vm2, %v3334_v4  ;;  %v910_v4 = vadd.f32 %v886_v19, %v827_v23 }
 0x1a7   : > { %v993_v29 = vadd.f32 %v969_v16, %v910_v4 }
 0x1a8   : > { %v733_v59 = vpop.f32.mrf.mxu3 }
 0x1a9   : > { %v749_v45 = vadd.f32 %v733_v59, %v3507_v39  ;;  %v1135_v18 = vpop.f32.mrf.mxu0 }
 0x1aa   : > { %v899_v60 = vpop.f32.mrf.mxu1 }
 0x1ab   : > { %v832_v62 = vadd.f32 %v816_v34, %v749_v45 }
 0x1ad   : > { %v3569_v0 = vadd.f32 %v899_v60, %v832_v62 }
 0x1b0   : > { %v3573_v9 = vpop.f32.mrf.mxu3 }
 0x1b1   : > { %v1138_v17 = vpop.f32.mrf.mxu0 }
 0x1b2   : > { %v3575_v10 = vpop.f32.mrf.mxu1 }
 0x1b5   : > { %2759 = vmatmul.msk.bf16.gmra.mxu3 %vm451_vm2, %v3340_v5  ;;  %v3597_v5 = vld [vmem:[%s3823_s4] ss:$0 sm:$0xff] }
 0x1b8   : > { %v738_v13 = vpop.f32.mrf.mxu3 }
 0x1b9   : > { %v751_v39 = vadd.f32 %v738_v13, %v3520_v63  ;;  %v972_v63 = vpop.f32.mrf.mxu2  ;;  %v1140_v47 = vpop.f32.mrf.mxu0 }
 0x1ba   : > { %v904_v14 = vpop.f32.mrf.mxu1  ;;  %v994_v19 = vadd.f32 %v972_v63, %v3547_v36 }
 0x1bb   : > { %v834_v52 = vadd.f32 %v821_v53, %v751_v39 }
 0x1bd   : > { %v3580_v3 = vadd.f32 %v904_v14, %v834_v52 }
 0x1c0   : > { %v3582_v27 = vpop.f32.mrf.mxu3 }
 0x1c1   : > { %v974_v24 = vpop.f32.mrf.mxu2  ;;  %v1143_v36 = vpop.f32.mrf.mxu0 }
 0x1c2   : > { %v3586_v20 = vpop.f32.mrf.mxu1  ;;  %v995_v7 = vadd.f32 %v974_v24, %v912_v15 }
 0x1c5   : > { %2760 = vmatmul.msk.bf16.gmra.mxu3 %vm451_vm2, %v3344_v6 }
 0x1c8   : > { %v1050_v11 = vpop.f32.mrf.mxu3 }
 0x1c9   : > { %v1075_v54 = vadd.f32 %v1050_v11, %v992_v30  ;;  %v977_v1 = vpop.f32.mrf.mxu2  ;;  %v1145_v24 = vpop.f32.mrf.mxu0 }
 0x1ca   : > { %v1216_v25 = vpop.f32.mrf.mxu1  ;;  %v996_v4 = vadd.f32 %v977_v1, %v3555_v41 }
 0x1cb   : > { %v1158_v26 = vadd.f32 %v1133_v12, %v1075_v54  ;;  %v658_v54 = vadd.f32 %v3565_v61, %v3501_v49 }
 0x1cd   : > { %v1241_v59 = vadd.f32 %v1216_v25, %v1158_v26  ;;  %v748_v41 = vadd.f32 %v3557_v43, %v658_v54 }
 0x1cf   : > { %v1255_v12 = vadd.f32 %v3597_v5, %v1241_v59  ;;  %v831_v15 = vadd.f32 %v3544_v21, %v748_v41 }
 0x1d0   : > { %v1052_v31 = vpop.f32.mrf.mxu3 }
 0x1d1   : > { %v1076_v34 = vadd.f32 %v1052_v31, %v993_v29  ;;  %v979_v63 = vpop.f32.mrf.mxu2  ;;  %v1148_v49 = vpop.f32.mrf.mxu0  ;;  %v914_v59 = vadd.f32 %v3559_v51, %v831_v15 }
 0x1d2   : > { %v1218_v44 = vpop.f32.mrf.mxu1 }
 0x1d3   : > { %v1159_v46 = vadd.f32 %v1135_v18, %v1076_v34  ;;  %v1265_v18 = vmax.f32 %v1255_v12, 0.0  ;;  %v997_v12 = vadd.f32 %v979_v63, %v914_v59  ;;  %v2981_v63 = vld [vmem:[#allocation4 + $0x38] sm:$0xff] }
 0x1d4   : > { %1554 = vmatpush.bf16.msrb.mxu2 %v2981_v63  ;;  %v3647_v63 = vld [vmem:[%s3825_s6] ss:$0 sm:$0xff] }
 0x1d5   : > { %v1242_v33 = vadd.f32 %v1218_v44, %v1159_v46  ;;  %v1275_v29 = vpack.c.bf16 %v1265_v18, %v1265_v18 }
 0x1d7   : > { %v1256_v40 = vadd.f32 %v3597_v5, %v1242_v33 }
 0x1d8   : > { %v1055_v37 = vpop.f32.mrf.mxu3 }
 0x1d9   : > { %v1077_v57 = vadd.f32 %v1055_v37, %v994_v19  ;;  %v1266_v45 = vmax.f32 %v1256_v40, 0.0  ;;  %v982_v37 = vpop.f32.mrf.mxu2  ;;  %v663_v40 = vadd.f32 %v3512_v55, %v3514_v56 }
 0x1da   : > { %v1221_v53 = vpop.f32.mrf.mxu1 }
 0x1db   : > { %v1160_v58 = vadd.f32 %v1138_v17, %v1077_v57  ;;  %v1276_v39 = vpack.c.bf16 %v1266_v45, %v1266_v45 }
 0x1dd   : > { %v1243_v60 = vadd.f32 %v1221_v53, %v1160_v58  ;;  %v1287_v38 = vunpack.c.l.b16 %v1276_v39  ;;  %v750_v58 = vadd.f32 %v3573_v9, %v663_v40 }
 0x1df   : > { %v1257_v62 = vadd.f32 %v3597_v5, %v1243_v60  ;;  %v833_v43 = vadd.f32 %v3553_v48, %v750_v58  ;;  %v998_v60 = vadd.f32 %v982_v37, %v3569_v0  ;;  %v1150_v48 = vpop.f32.mrf.mxu0  ;;  %v668_v0 = vadd.f32 %v3523_v32, %v3527_v2 }
 0x1e0   : > { %v1057_v13 = vpop.f32.mrf.mxu3 }
 0x1e1   : > { %v1267_v14 = vmax.f32 %v1257_v62, 0.0  ;;  %v1078_v52 = vadd.f32 %v1057_v13, %v995_v7  ;;  %v984_v56 = vpop.f32.mrf.mxu2  ;;  %v916_v21 = vadd.f32 %v3575_v10, %v833_v43  ;;  %v752_v10 = vadd.f32 %v3582_v27, %v668_v0  ;;  %v2974_v0 = vld [vmem:[#allocation4] sm:$0xff] }
 0x1e2   : > { %v1223_v16 = vpop.f32.mrf.mxu1 }
 0x1e3   : > { %v1277_v28 = vpack.c.bf16 %v1267_v14, %v1267_v14  ;;  %v1161_v6 = vadd.f32 %v1140_v47, %v1078_v52  ;;  %v999_v52 = vadd.f32 %v984_v56, %v916_v21 }
 0x1e5   : > { %v1288_v22 = vunpack.c.l.b16 %v1277_v28  ;;  %v1244_v23 = vadd.f32 %v1223_v16, %v1161_v6 }
 0x1e7   : > { %v1289_v11 = vpack.c.b16 %v1288_v22, %v1287_v38  ;;  %v1258_v25 = vadd.f32 %v3597_v5, %v1244_v23  ;;  %v1153_v2 = vpop.f32.mrf.mxu0 }
 0x1e8   : > { %v1060_v17 = vpop.f32.mrf.mxu3 }
 0x1e9   : > { %v1290_v31 = vrot.slane %v1289_v11, 5  ;;  %v1268_v35 = vmax.f32 %v1258_v25, 0.0  ;;  %v1079_v34 = vadd.f32 %v1060_v17, %v996_v4  ;;  %v987_v23 = vpop.f32.mrf.mxu2  ;;  %v2980_v17 = vld [vmem:[#allocation4 + $0x30] sm:$0xff] }
 0x1ea   : > { %v1226_v44 = vpop.f32.mrf.mxu1  ;;  %v1000_v32 = vadd.f32 %v987_v23, %v3580_v3  ;;  %1555 = vmatpush.bf16.msrb.mxu2 %v2980_v17  ;;  %v3642_v23 = vld [vmem:[%s3827_s8] ss:$0 sm:$0xff] }
 0x1eb   : > { %v1278_v42 = vpack.c.bf16 %v1268_v35, %v1268_v35  ;;  %v1162_v30 = vadd.f32 %v1143_v36, %v1079_v34  ;;  %v1316_v46 = vsel %vm1313_vm3, %v1275_v29, %v1290_v31  ;;  %v835_v29 = vadd.f32 %v3571_v8, %v752_v10  ;;  %v2986_v10 = vld [vmem:[#allocation4 + $0x60] sm:$0xff] }
 0x1ec   : > { %2745 = vmatmul.msk.bf16.vlgmr.msra.gmra.mxu2 %vm501_vm0, %v1316_v46 }
 0x1ed   : > { %v1292_v33 = vunpack.c.l.b16 %v1278_v42  ;;  %v1245_v47 = vadd.f32 %v1226_v44, %v1162_v30  ;;  %v2979_v30 = vld [vmem:[#allocation4 + $0x28] sm:$0xff]  ;;  %v918_v46 = vadd.f32 %v3586_v20, %v835_v29  ;;  %v2992_v29 = vld [vmem:[#allocation4 + $0x90] sm:$0xff] }
 0x1ee   : > { %1556 = vmatpush.bf16.msrb.mxu2 %v2979_v30  ;;  %v1657_v30 = vld [vmem:[#allocation3 + $0x2] sm:$0xff] }
 0x1ef   : > { %v1259_v50 = vadd.f32 %v3597_v5, %v1245_v47  ;;  %v1293_v19 = vpack.c.b16 %v1292_v33, %v1288_v22 }
 0x1f0   : > { %v1062_v26 = vpop.f32.mrf.mxu3 }
 0x1f1   : > { %v1269_v57 = vmax.f32 %v1259_v50, 0.0  ;;  %v1294_v36 = vrot.slane %v1293_v19, 2  ;;  %v1080_v51 = vadd.f32 %v1062_v26, %v997_v12  ;;  %v989_v19 = vpop.f32.mrf.mxu2 }
 0x1f2   : > { %v1228_v53 = vpop.f32.mrf.mxu1  ;;  %v1001_v26 = vadd.f32 %v989_v19, %v918_v46 }
 0x1f3   : > { %v1279_v1 = vpack.c.bf16 %v1269_v57, %v1269_v57  ;;  %v1163_v28 = vadd.f32 %v1145_v24, %v1080_v51  ;;  %v2978_v51 = vld [vmem:[#allocation4 + $0x20] sm:$0xff] }
 0x1f4   : > { %1557 = vmatpush.bf16.msrb.mxu2 %v2978_v51 }
 0x1f5   : > { %v1296_v61 = vunpack.c.l.b16 %v1279_v1  ;;  %v1246_v11 = vadd.f32 %v1228_v53, %v1163_v28  ;;  %v1155_v1 = vpop.f32.mrf.mxu0  ;;  %v2982_v28 = vld [vmem:[#allocation4 + $0x40] sm:$0xff] }
 0x1f7   : > { %v1297_v45 = vpack.c.b16 %v1296_v61, %v1292_v33  ;;  %v1260_v34 = vadd.f32 %v3597_v5, %v1246_v11 }
 0x1f8   : > { %v1065_v62 = vpop.f32.mrf.mxu3 }
 0x1f9   : > { %v1081_v7 = vadd.f32 %v1065_v62, %v998_v60  ;;  %v1298_v55 = vrot.slane %v1297_v45, 7  ;;  %v1270_v47 = vmax.f32 %v1260_v34, 0.0 }
 0x1fa   : > { %v1231_v13 = vpop.f32.mrf.mxu1 }
 0x1fb   : > { %v1164_v9 = vadd.f32 %v1148_v49, %v1081_v7  ;;  %v1319_v39 = vsel %vm1313_vm3, %v1294_v36, %v1298_v55  ;;  %v1280_v57 = vpack.c.bf16 %v1270_v47, %v1270_v47 }
 0x1fc   : > { %2746 = vmatmul.msk.bf16.gmra.mxu2 %vm501_vm0, %v1319_v39  ;;  %v2985_v39 = vld [vmem:[#allocation4 + $0x58] sm:$0xff] }
 0x1fd   : > { %v1247_v14 = vadd.f32 %v1231_v13, %v1164_v9  ;;  %v2977_v9 = vld [vmem:[#allocation4 + $0x18] sm:$0xff]  ;;  %1724 = vmatpush.bf16.msra.mxu0 %v2985_v39 }
 0x1fe   : > { %1627 = vmatpush.bf16.msra.mxu3 %v2977_v9 }
 0x1ff   : > { %v1261_v6 = vadd.f32 %v3597_v5, %v1247_v14  ;;  %v2976_v14 = vld [vmem:[#allocation4 + $0x10] sm:$0xff] }
 0x200   : > { %v1067_v16 = vpop.f32.mrf.mxu3 }
 0x201   : > { %v1082_v18 = vadd.f32 %v1067_v16, %v999_v52  ;;  %v1271_v25 = vmax.f32 %v1261_v6, 0.0  ;;  %v2983_v52 = vld [vmem:[#allocation4 + $0x48] sm:$0xff]  ;;  %v2989_v16 = vld [vmem:[#allocation4 + $0x78] sm:$0xff]  ;;  %v2988_v6 = vld [vmem:[#allocation4 + $0x70] sm:$0xff] }
 0x202   : > { %v1233_v38 = vpop.f32.mrf.mxu1  ;;  %1628 = vmatpush.bf16.msra.mxu3 %v2976_v14  ;;  %1831 = vmatpush.bf16.msrb.mxu1 %v2989_v16 }
 0x203   : > { %v1165_v22 = vadd.f32 %v1150_v48, %v1082_v18  ;;  %v1281_v24 = vpack.c.bf16 %v1271_v25, %v1271_v25  ;;  %v2984_v48 = vld [vmem:[#allocation4 + $0x50] sm:$0xff]  ;;  %v2987_v18 = vld [vmem:[#allocation4 + $0x68] sm:$0xff] }
 0x204   : > { %1725 = vmatpush.bf16.msra.mxu0 %v2984_v48  ;;  %v2990_v48 = vld [vmem:[#allocation4 + $0x80] sm:$0xff] }
 0x205   : > { %v1248_v4 = vadd.f32 %v1233_v38, %v1165_v22  ;;  %v1301_v8 = vunpack.c.l.b16 %v1281_v24  ;;  %v2993_v38 = vld [vmem:[#allocation4 + $0x98] sm:$0xff] }
 0x206   : > { %1832 = vmatpush.bf16.msrb.mxu1 %v2988_v6  ;;  %1938 = vmatpush.bf16.msra.mxu2 %v2993_v38 }
 0x207   : > { %v1262_v31 = vadd.f32 %v3597_v5, %v1248_v4 }
 0x208   : > { %v1070_v35 = vpop.f32.mrf.mxu3  ;;  %1726 = vmatpush.bf16.msra.mxu0 %v2983_v52 }
 0x209   : > { %v1272_v27 = vmax.f32 %v1262_v31, 0.0  ;;  %v1083_v44 = vadd.f32 %v1070_v35, %v1000_v32 }
 0x20a   : > { %v1236_v42 = vpop.f32.mrf.mxu1  ;;  %1833 = vmatpush.bf16.msrb.mxu1 %v2987_v18  ;;  %1939 = vmatpush.bf16.msra.mxu2 %v2992_v29  ;;  %v2997_v29 = vld [vmem:[#allocation4 + $0xb8] sm:$0xff] }
 0x20b   : > { %v1282_v54 = vpack.c.bf16 %v1272_v27, %v1272_v27  ;;  %v1166_v33 = vadd.f32 %v1153_v2, %v1083_v44  ;;  %v1487_v44 = vld [vmem:[#allocation3 + $0x1] sm:$0xff] }
 0x20c   : > { %1727 = vmatpush.bf16.msra.mxu0 %v2982_v28 }
 0x20d   : > { %v1302_v41 = vunpack.c.l.b16 %v1282_v54  ;;  %v1249_v50 = vadd.f32 %v1236_v42, %v1166_v33  ;;  %v1464_v42 = vld [vmem:[#allocation3] sm:$0xff] }
 0x20e   : > { %1834 = vmatpush.bf16.msrb.mxu1 %v2986_v10 }
 0x20f   : > { %v1303_v3 = vpack.c.b16 %v1302_v41, %v1301_v8  ;;  %v1263_v37 = vadd.f32 %v3597_v5, %v1249_v50 }
 0x210   : > { %v1072_v40 = vpop.f32.mrf.mxu3 }
 0x211   : > { %v1273_v53 = vmax.f32 %v1263_v37, 0.0  ;;  %v1084_v15 = vadd.f32 %v1072_v40, %v1001_v26  ;;  %v1304_v58 = vrot.slane %v1303_v3, 5 }
 0x212   : > { %v1238_v61 = vpop.f32.mrf.mxu1 }
 0x213   : > { %v1167_v49 = vadd.f32 %v1155_v1, %v1084_v15  ;;  %v1322_v20 = vsel %vm1313_vm3, %v1280_v57, %v1304_v58  ;;  %v1283_v59 = vpack.c.bf16 %v1273_v53, %v1273_v53 }
 0x214   : > { %2747 = vmatmul.msk.bf16.gmra.mxu2 %vm501_vm0, %v1322_v20 }
 0x215   : > { %v1250_v43 = vadd.f32 %v1238_v61, %v1167_v49  ;;  %v1306_v60 = vunpack.c.l.b16 %v1283_v59 }
 0x217   : > { %v1264_v45 = vadd.f32 %v3597_v5, %v1250_v43  ;;  %v1307_v36 = vpack.c.b16 %v1306_v60, %v1302_v41  ;;  %v2975_v5 = vld [vmem:[#allocation4 + $0x8] sm:$0xff] }
 0x218   : > { %1629 = vmatpush.bf16.msra.mxu3 %v2975_v5  ;;  %v1404_v22 = vpop.f32.mrf.mxu3 }
 0x219   : > { %v1274_v62 = vmax.f32 %v1264_v45, 0.0  ;;  %v1308_v13 = vrot.slane %v1307_v36, 2  ;;  %v1405_v11 = vadd.f32 %v3642_v23, %v1404_v22 }
 0x21b   : > { %v1284_v7 = vpack.c.bf16 %v1274_v62, %v1274_v62 }
 0x21c   : > { %1630 = vmatpush.bf16.msra.mxu3 %v2974_v0 }
 0x21d   : > { %v1310_v55 = vunpack.c.l.b16 %v1284_v7 }
 0x21f   : > { %v1311_v56 = vpack.c.b16 %v1310_v55, %v1306_v60 }
 0x220   : > { %v1406_v17 = vpop.f32.mrf.mxu3  ;;  %2045 = vmatpush.bf16.msrb.mxu3 %v2997_v29 }
 0x221   : > { %v1312_v21 = vrot.slane %v1311_v56, 7  ;;  %v1407_v35 = vadd.f32 %v3642_v23, %v1406_v17 }
 0x223   : > { %v1325_v12 = vsel %vm1313_vm3, %v1308_v13, %v1312_v21  ;;  %v2991_v13 = vld [vmem:[#allocation4 + $0x88] sm:$0xff] }
 0x224   : > { %2748 = vmatmul.msk.bf16.gmra.mxu2 %vm501_vm0, %v1325_v12 }
 0x225   : > { %1940 = vmatpush.bf16.msra.mxu2 %v2991_v13 }
 0x228   : > { %v1409_v27 = vpop.f32.mrf.mxu3 }
 0x229   : > { %v1410_v8 = vadd.f32 %v3642_v23, %v1409_v27  ;;  %1941 = vmatpush.bf16.msra.mxu2 %v2990_v48 }
 0x230   : > { %v1411_v57 = vpop.f32.mrf.mxu3 }
 0x231   : > { %v1412_v1 = vadd.f32 %v3642_v23, %v1411_v57 }
 0x238   : > { %v1414_v7 = vpop.f32.mrf.mxu3 }
 0x239   : > { %v1415_v12 = vadd.f32 %v3642_v23, %v1414_v7 }
 0x240   : > { %v1416_v14 = vpop.f32.mrf.mxu3 }
 0x248   : > { %v1419_v17 = vpop.f32.mrf.mxu3 }
 0x249   : > { %v1420_v27 = vadd.f32 %v3642_v23, %v1419_v17 }
 0x26f   : > { %v1355_v25 = vpop.f32.mrf.mxu2 }
 0x270   : > { %v1356_v4 = vadd.f32 %v3647_v63, %v1355_v25  ;;  %v1417_v25 = vadd.f32 %v3642_v23, %v1416_v14 }
 0x272   : > { %v1424_v31 = vadd.f32 %v1405_v11, %v1356_v4 }
 0x274   : > { %v1432_v32 = vmax.f32 %v1424_v31, 0.0  ;;  %v3001_v31 = vld [vmem:[#allocation4 + $0xd8] sm:$0xff] }
 0x275   : > { %2152 = vmatpush.bf16.msrb.mxu0 %v3001_v31 }
 0x276   : > { %1456 = vst.msk [vmem:[#allocation3 + $0xb] sm:$0xff] %vm1440_vm1, %v1432_v32 }
 0x277   : > { %v1357_v2 = vpop.f32.mrf.mxu2 }
 0x278   : > { %v1358_v34 = vadd.f32 %v3647_v63, %v1357_v2  ;;  %v2996_v2 = vld [vmem:[#allocation4 + $0xb0] sm:$0xff] }
 0x279   : > { %2046 = vmatpush.bf16.msrb.mxu3 %v2996_v2 }
 0x27a   : > { %v1425_v24 = vadd.f32 %v1407_v35, %v1358_v34  ;;  %v3000_v35 = vld [vmem:[#allocation4 + $0xd0] sm:$0xff] }
 0x27b   : > { %2153 = vmatpush.bf16.msrb.mxu0 %v3000_v35 }
 0x27c   : > { %v1433_v46 = vmax.f32 %v1425_v24, 0.0 }
 0x27d   : > { %v1488_v54 = vld [vmem:[#allocation3 + $0x9] sm:$0xff] }
 0x27e   : > { %v1465_v33 = vld [vmem:[#allocation3 + $0x8] sm:$0xff]  ;;  %1457 = vst.msk [vmem:[#allocation3 + $0x15] sm:$0xff] %vm1440_vm1, %v1433_v46  ;;  %v1497_v41 = vpack.c.bf16 %v1488_v54, %v1487_v44  ;;  %v2995_v46 = vld [vmem:[#allocation4 + $0xa8] sm:$0xff] }
 0x27f   : > { %v1658_v47 = vld [vmem:[#allocation3 + $0xa] sm:$0xff]  ;;  %v1474_v50 = vpack.c.bf16 %v1465_v33, %v1464_v42  ;;  %v1360_v3 = vpop.f32.mrf.mxu2  ;;  %v2999_v54 = vld [vmem:[#allocation4 + $0xc8] sm:$0xff]  ;;  %2047 = vmatpush.bf16.msrb.mxu3 %v2995_v46 }
 0x280   : > { %v1667_v19 = vpack.c.bf16 %v1658_v47, %v1657_v30  ;;  %v1361_v37 = vadd.f32 %v3647_v63, %v1360_v3  ;;  %2777 = vmatmul.msk.bf16.vlgmr.msrb.gmra.mxu2 %vm1440_vm1, %v1497_v41  ;;  %v3005_v33 = vld [vmem:[#allocation4 + $0xf8] sm:$0xff]  ;;  %v3004_v41 = vld [vmem:[#allocation4 + $0xf0] sm:$0xff]  ;;  %2154 = vmatpush.bf16.msrb.mxu0 %v2999_v54 }
 0x281   : > { %2798 = vmatmul.msk.bf16.vlgmr.msra.gmra.mxu3 %vm1440_vm1, %v1474_v50  ;;  %2259 = vmatpush.bf16.msra.mxu1 %v3005_v33  ;;  %v2994_v50 = vld [vmem:[#allocation4 + $0xa0] sm:$0xff] }
 0x282   : > { %2819 = vmatmul.msk.bf16.vlgmr.msra.gmra.mxu0 %vm1440_vm1, %v1667_v19  ;;  %v1426_v26 = vadd.f32 %v1410_v8, %v1361_v37  ;;  %v1421_v8 = vpop.f32.mrf.mxu3  ;;  %v2998_v19 = vld [vmem:[#allocation4 + $0xc0] sm:$0xff] }
 0x283   : > { %2048 = vmatpush.bf16.msrb.mxu3 %v2994_v50 }
 0x284   : > { %v1434_v40 = vmax.f32 %v1426_v26, 0.0  ;;  %2155 = vmatpush.bf16.msrb.mxu0 %v2998_v19 }
 0x285   : > { %v1765_v53 = vld [vmem:[#allocation3 + $0x12] sm:$0xff]  ;;  %2260 = vmatpush.bf16.msra.mxu1 %v3004_v41 }
 0x286   : > { %1458 = vst.msk [vmem:[#allocation3 + $0x1f] sm:$0xff] %vm1440_vm1, %v1434_v40  ;;  %v1774_v15 = vpack.c.bf16 %v1765_v53, %v1658_v47  ;;  %v1489_v59 = vld [vmem:[#allocation3 + $0x11] sm:$0xff]  ;;  %v1422_v40 = vadd.f32 %v3642_v23, %v1421_v8 }
 0x287   : > { %v1362_v58 = vpop.f32.mrf.mxu2  ;;  %v1466_v43 = vld [vmem:[#allocation3 + $0x10] sm:$0xff] }
 0x288   : > { %v1363_v49 = vadd.f32 %v3647_v63, %v1362_v58  ;;  %2840 = vmatmul.msk.bf16.vlgmr.msrb.gmra.mxu1 %vm1440_vm1, %v1774_v15  ;;  %v3009_v23 = vld [vmem:[#allocation4 + $0x118] sm:$0xff] }
 0x289   : > { %2366 = vmatpush.bf16.msrb.mxu2 %v3009_v23  ;;  %v1872_v48 = vld [vmem:[#allocation3 + $0x13] sm:$0xff] }
 0x28a   : > { %v1427_v20 = vadd.f32 %v1412_v1, %v1363_v49 }
 0x28c   : > { %v1435_v61 = vmax.f32 %v1427_v20, 0.0 }
 0x28d   : > { %v1490_v45 = vld [vmem:[#allocation3 + $0x19] sm:$0xff]  ;;  %v1491_v6 = vld [vmem:[#allocation3 + $0x21] sm:$0xff] }
 0x28e   : > { %v1467_v60 = vld [vmem:[#allocation3 + $0x18] sm:$0xff]  ;;  %1459 = vst.msk [vmem:[#allocation3 + $0x29] sm:$0xff] %vm1440_vm1, %v1435_v61  ;;  %v1498_v36 = vpack.c.bf16 %v1490_v45, %v1489_v59  ;;  %v1468_v18 = vld [vmem:[#allocation3 + $0x20] sm:$0xff] }
 0x28f   : > { %v1660_v62 = vld [vmem:[#allocation3 + $0x1a] sm:$0xff]  ;;  %v1475_v55 = vpack.c.bf16 %v1467_v60, %v1466_v43 }
 0x290   : > { %v1668_v56 = vpack.c.bf16 %v1660_v62, %v1765_v53  ;;  %2778 = vmatmul.msk.bf16.gmra.mxu2 %vm1440_vm1, %v1498_v36  ;;  %v3003_v59 = vld [vmem:[#allocation4 + $0xe8] sm:$0xff]  ;;  %v3002_v45 = vld [vmem:[#allocation4 + $0xe0] sm:$0xff] }
 0x291   : > { %2799 = vmatmul.msk.bf16.gmra.mxu3 %vm1440_vm1, %v1475_v55  ;;  %2261 = vmatpush.bf16.msra.mxu1 %v3003_v59  ;;  %v1873_v29 = vld [vmem:[#allocation3 + $0x1b] sm:$0xff] }
 0x292   : > { %2820 = vmatmul.msk.bf16.gmra.mxu0 %vm1440_vm1, %v1668_v56 }
 0x295   : > { %v1767_v21 = vld [vmem:[#allocation3 + $0x22] sm:$0xff]  ;;  %v1662_v28 = vld [vmem:[#allocation3 + $0x2a] sm:$0xff]  ;;  %2262 = vmatpush.bf16.msra.mxu1 %v3002_v45 }
 0x296   : > { %v1775_v9 = vpack.c.bf16 %v1767_v21, %v1660_v62  ;;  %v1492_v52 = vld [vmem:[#allocation3 + $0x29] sm:$0xff]  ;;  %v1669_v11 = vpack.c.bf16 %v1662_v28, %v1767_v21 }
 0x297   : > { %v1365_v39 = vpop.f32.mrf.mxu2  ;;  %v1469_v16 = vld [vmem:[#allocation3 + $0x28] sm:$0xff]  ;;  %v1499_v38 = vpack.c.bf16 %v1492_v52, %v1491_v6  ;;  %v2086_v52 = vld [vmem:[#allocation3 + $0x1c] sm:$0xff] }
 0x298   : > { %v1366_v51 = vadd.f32 %v3647_v63, %v1365_v39  ;;  %2841 = vmatmul.msk.bf16.gmra.mxu1 %vm1440_vm1, %v1775_v9  ;;  %v1476_v10 = vpack.c.bf16 %v1469_v16, %v1468_v18  ;;  %v3008_v39 = vld [vmem:[#allocation4 + $0x110] sm:$0xff] }
 0x299   : > { %2367 = vmatpush.bf16.msrb.mxu2 %v3008_v39  ;;  %v1871_v16 = vld [vmem:[#allocation3 + $0xb] sm:$0xff] }
 0x29a   : > { %v1428_v5 = vadd.f32 %v1415_v12, %v1366_v51  ;;  %v1875_v46 = vld [vmem:[#allocation3 + $0x2b] sm:$0xff] }
 0x29c   : > { %v1436_v0 = vmax.f32 %v1428_v5, 0.0  ;;  %v1979_v5 = vld [vmem:[#allocation3 + $0x14] sm:$0xff] }
 0x29d   : > { %v2095_v18 = vpack.c.bf16 %v2086_v52, %v1979_v5 }
 0x29e   : > { %1460 = vst.msk [vmem:[#allocation3 + $0x33] sm:$0xff] %vm1440_vm1, %v1436_v0  ;;  %v1978_v0 = vld [vmem:[#allocation3 + $0xc] sm:$0xff] }
 0x29f   : > { %v1367_v22 = vpop.f32.mrf.mxu2  ;;  %v1988_v6 = vpack.c.bf16 %v1979_v5, %v1978_v0  ;;  %v2201_v0 = vld [vmem:[#allocation3 + $0x5d] sm:$0xff] }
 0x2a0   : > { %v1368_v4 = vadd.f32 %v3647_v63, %v1367_v22  ;;  %2779 = vmatmul.msk.bf16.gmra.mxu2 %vm1440_vm1, %v1499_v38  ;;  %v2193_v38 = vld [vmem:[#allocation3 + $0x1d] sm:$0xff] }
 0x2a1   : > { %2800 = vmatmul.msk.bf16.gmra.mxu3 %vm1440_vm1, %v1476_v10  ;;  %v2192_v10 = vld [vmem:[#allocation3 + $0x15] sm:$0xff] }
 0x2a2   : > { %2821 = vmatmul.msk.bf16.gmra.mxu0 %vm1440_vm1, %v1669_v11  ;;  %v1429_v32 = vadd.f32 %v1417_v25, %v1368_v4  ;;  %v2202_v22 = vpack.c.bf16 %v2193_v38, %v2192_v10  ;;  %v3007_v11 = vld [vmem:[#allocation4 + $0x108] sm:$0xff] }
 0x2a3   : > { %2368 = vmatpush.bf16.msrb.mxu2 %v3007_v11  ;;  %v1874_v25 = vld [vmem:[#allocation3 + $0x23] sm:$0xff] }
 0x2a4   : > { %v1437_v34 = vmax.f32 %v1429_v32, 0.0  ;;  %v1981_v4 = vld [vmem:[#allocation3 + $0x24] sm:$0xff]  ;;  %v1882_v31 = vpack.c.bf16 %v1874_v25, %v1873_v29 }
 0x2a5   : > { %v1769_v24 = vld [vmem:[#allocation3 + $0x32] sm:$0xff]  ;;  %v1989_v32 = vpack.c.bf16 %v1981_v4, %v2086_v52 }
 0x2a6   : > { %1461 = vst.msk [vmem:[#allocation3 + $0x3d] sm:$0xff] %vm1440_vm1, %v1437_v34  ;;  %v1776_v44 = vpack.c.bf16 %v1769_v24, %v1662_v28  ;;  %v1493_v37 = vld [vmem:[#allocation3 + $0x31] sm:$0xff]  ;;  %v1881_v28 = vpack.c.bf16 %v1872_v48, %v1871_v16  ;;  %v2194_v34 = vld [vmem:[#allocation3 + $0x25] sm:$0xff] }
 0x2a7   : > { %v1370_v42 = vpop.f32.mrf.mxu2  ;;  %v1470_v26 = vld [vmem:[#allocation3 + $0x30] sm:$0xff] }
 0x2a8   : > { %v1371_v30 = vadd.f32 %v3647_v63, %v1370_v42  ;;  %2842 = vmatmul.msk.bf16.gmra.mxu1 %vm1440_vm1, %v1776_v44  ;;  %v2088_v17 = vld [vmem:[#allocation3 + $0x2c] sm:$0xff]  ;;  %v1983_v44 = vld [vmem:[#allocation3 + $0x34] sm:$0xff] }
 0x2a9   : > { %v2096_v2 = vpack.c.bf16 %v2088_v17, %v1981_v4  ;;  %v2195_v35 = vld [vmem:[#allocation3 + $0x2d] sm:$0xff]  ;;  %v1990_v33 = vpack.c.bf16 %v1983_v44, %v2088_v17  ;;  %v2196_v41 = vld [vmem:[#allocation3 + $0x35] sm:$0xff]  ;;  %v2300_v4 = vld [vmem:[#allocation3 + $0x1e] sm:$0xff] }
 0x2aa   : > { %v1430_v47 = vadd.f32 %v1420_v27, %v1371_v30  ;;  %v1876_v27 = vld [vmem:[#allocation3 + $0x33] sm:$0xff] }
 0x2ab   : > { %v3006_v30 = vld [vmem:[#allocation4 + $0x100] sm:$0xff]  ;;  %v1883_v54 = vpack.c.bf16 %v1876_v27, %v1875_v46 }
 0x2ac   : > { %v1438_v3 = vmax.f32 %v1430_v47, 0.0  ;;  %2369 = vmatpush.bf16.msrb.mxu2 %v3006_v30 }
 0x2ad   : > { %v1494_v57 = vld [vmem:[#allocation3 + $0x39] sm:$0xff] }
 0x2ae   : > { %v1471_v53 = vld [vmem:[#allocation3 + $0x38] sm:$0xff]  ;;  %1462 = vst.msk [vmem:[#allocation3 + $0x47] sm:$0xff] %vm1440_vm1, %v1438_v3  ;;  %v1500_v58 = vpack.c.bf16 %v1494_v57, %v1493_v37 }
 0x2af   : > { %v1664_v15 = vld [vmem:[#allocation3 + $0x3a] sm:$0xff]  ;;  %v1477_v1 = vpack.c.bf16 %v1471_v53, %v1470_v26  ;;  %v1372_v20 = vpop.f32.mrf.mxu2 }
 0x2b0   : > { %v1670_v49 = vpack.c.bf16 %v1664_v15, %v1769_v24  ;;  %v1373_v61 = vadd.f32 %v3647_v63, %v1372_v20  ;;  %2780 = vmatmul.msk.bf16.gmra.mxu2 %vm1440_vm1, %v1500_v58  ;;  %v2203_v24 = vpack.c.bf16 %v2195_v35, %v2194_v34  ;;  %v2090_v42 = vld [vmem:[#allocation3 + $0x3c] sm:$0xff] }
 0x2b1   : > { %2801 = vmatmul.msk.bf16.gmra.mxu3 %vm1440_vm1, %v1477_v1  ;;  %v2097_v47 = vpack.c.bf16 %v2090_v42, %v1983_v44  ;;  %v2197_v8 = vld [vmem:[#allocation3 + $0x3d] sm:$0xff] }
 0x2b2   : > { %2822 = vmatmul.msk.bf16.gmra.mxu0 %vm1440_vm1, %v1670_v49  ;;  %v1431_v43 = vadd.f32 %v1422_v40, %v1373_v61  ;;  %v2204_v50 = vpack.c.bf16 %v2197_v8, %v2196_v41  ;;  %v1877_v26 = vld [vmem:[#allocation3 + $0x3b] sm:$0xff]  ;;  %v2302_v8 = vld [vmem:[#allocation3 + $0x2e] sm:$0xff] }
 0x2b4   : > { %v1439_v60 = vmax.f32 %v1431_v43, 0.0 }
 0x2b5   : > { %v1771_v62 = vld [vmem:[#allocation3 + $0x42] sm:$0xff] }
 0x2b6   : > { %1463 = vst.msk [vmem:[#allocation3 + $0x51] sm:$0xff] %vm1440_vm1, %v1439_v60  ;;  %v1777_v7 = vpack.c.bf16 %v1771_v62, %v1664_v15  ;;  %v1495_v63 = vld [vmem:[#allocation3 + $0x41] sm:$0xff]  ;;  %v1496_v36 = vld [vmem:[#allocation3 + $0x49] sm:$0xff] }
 0x2b7   : > { %v1472_v55 = vld [vmem:[#allocation3 + $0x40] sm:$0xff]  ;;  %v1473_v56 = vld [vmem:[#allocation3 + $0x48] sm:$0xff]  ;;  %v1501_v21 = vpack.c.bf16 %v1496_v36, %v1495_v63 }
 0x2b8   : > { %2843 = vmatmul.msk.bf16.gmra.mxu1 %vm1440_vm1, %v1777_v7  ;;  %v1478_v12 = vpack.c.bf16 %v1473_v56, %v1472_v55  ;;  %v1878_v19 = vld [vmem:[#allocation3 + $0x43] sm:$0xff] }
 0x2b9   : > { %v1985_v3 = vld [vmem:[#allocation3 + $0x44] sm:$0xff]  ;;  %v1884_v57 = vpack.c.bf16 %v1878_v19, %v1877_v26 }
 0x2ba   : > { %v1991_v53 = vpack.c.bf16 %v1985_v3, %v2090_v42  ;;  %v2198_v23 = vld [vmem:[#allocation3 + $0x45] sm:$0xff] }
 0x2bb   : > { %v2301_v19 = vld [vmem:[#allocation3 + $0x26] sm:$0xff] }
 0x2bc   : > { %v2310_v26 = vpack.c.bf16 %v2302_v8, %v2301_v19 }
 0x2bd   : > { %v1666_v13 = vld [vmem:[#allocation3 + $0x4a] sm:$0xff]  ;;  %v1773_v51 = vld [vmem:[#allocation3 + $0x52] sm:$0xff] }
 0x2be   : > { %v1671_v9 = vpack.c.bf16 %v1666_v13, %v1771_v62  ;;  %v1778_v14 = vpack.c.bf16 %v1773_v51, %v1666_v13  ;;  %v2092_v37 = vld [vmem:[#allocation3 + $0x4c] sm:$0xff]  ;;  %v1987_v55 = vld [vmem:[#allocation3 + $0x54] sm:$0xff]  ;;  %v2094_v13 = vld [vmem:[#allocation3 + $0x5c] sm:$0xff] }
 0x2bf   : > { %v2098_v15 = vpack.c.bf16 %v2092_v37, %v1985_v3  ;;  %v2199_v49 = vld [vmem:[#allocation3 + $0x4d] sm:$0xff]  ;;  %v1992_v51 = vpack.c.bf16 %v1987_v55, %v2092_v37  ;;  %v2200_v16 = vld [vmem:[#allocation3 + $0x55] sm:$0xff] }
 0x2c0   : > { %2781 = vmatmul.msk.bf16.gmra.mxu2 %vm1440_vm1, %v1501_v21  ;;  %v2205_v45 = vpack.c.bf16 %v2199_v49, %v2198_v23  ;;  %v1879_v63 = vld [vmem:[#allocation3 + $0x4b] sm:$0xff]  ;;  %v1880_v36 = vld [vmem:[#allocation3 + $0x53] sm:$0xff]  ;;  %v2206_v10 = vpack.c.bf16 %v2201_v0, %v2200_v16 }
 0x2c1   : > { %2802 = vmatmul.msk.bf16.gmra.mxu3 %vm1440_vm1, %v1478_v12  ;;  %v1885_v39 = vpack.c.bf16 %v1880_v36, %v1879_v63  ;;  %v2305_v0 = vld [vmem:[#allocation3 + $0x46] sm:$0xff] }
 0x2c2   : > { %2823 = vmatmul.msk.bf16.gmra.mxu0 %vm1440_vm1, %v1671_v9 }
 0x2c8   : > { %2844 = vmatmul.msk.bf16.gmra.mxu1 %vm1440_vm1, %v1778_v14  ;;  %v2099_v14 = vpack.c.bf16 %v2094_v13, %v1987_v55 }
 0x2d0   : > { %2861 = vmatmul.msk.bf16.vlgmr.msra.gmra.mxu2 %vm1440_vm1, %v1881_v28 }
 0x2d1   : > { %2882 = vmatmul.msk.bf16.vlgmr.msrb.gmra.mxu3 %vm1440_vm1, %v1988_v6 }
 0x2d2   : > { %2903 = vmatmul.msk.bf16.vlgmr.msrb.gmra.mxu0 %vm1440_vm1, %v2095_v18 }
 0x2d8   : > { %2924 = vmatmul.msk.bf16.vlgmr.msra.gmra.mxu1 %vm1440_vm1, %v2202_v22 }
 0x2e0   : > { %2862 = vmatmul.msk.bf16.gmra.mxu2 %vm1440_vm1, %v1882_v31  ;;  %v2299_v31 = vld [vmem:[#allocation3 + $0x16] sm:$0xff] }
 0x2e1   : > { %2883 = vmatmul.msk.bf16.gmra.mxu3 %vm1440_vm1, %v1989_v32  ;;  %v2309_v35 = vpack.c.bf16 %v2300_v4, %v2299_v31  ;;  %v2307_v4 = vld [vmem:[#allocation3 + $0x56] sm:$0xff] }
 0x2e2   : > { %2904 = vmatmul.msk.bf16.gmra.mxu0 %vm1440_vm1, %v2096_v2 }
 0x2e8   : > { %2925 = vmatmul.msk.bf16.gmra.mxu1 %vm1440_vm1, %v2203_v24 }
 0x2f0   : > { %2863 = vmatmul.msk.bf16.gmra.mxu2 %vm1440_vm1, %v1883_v54 }
 0x2f1   : > { %2884 = vmatmul.msk.bf16.gmra.mxu3 %vm1440_vm1, %v1990_v33 }
 0x2f2   : > { %2905 = vmatmul.msk.bf16.gmra.mxu0 %vm1440_vm1, %v2097_v47 }
 0x2f8   : > { %2926 = vmatmul.msk.bf16.gmra.mxu1 %vm1440_vm1, %v2204_v50 }
 0x2ff   : > { %v1729_v40 = vpop.f32.mrf.mxu0 }
 0x300   : > { %2864 = vmatmul.msk.bf16.gmra.mxu2 %vm1440_vm1, %v1884_v57 }
 0x301   : > { %2885 = vmatmul.msk.bf16.gmra.mxu3 %vm1440_vm1, %v1991_v53 }
 0x302   : > { %2906 = vmatmul.msk.bf16.gmra.mxu0 %vm1440_vm1, %v2098_v15 }
 0x303   : > { %v1559_v58 = vpop.f32.mrf.mxu2 }
 0x304   : > { %v1632_v1 = vpop.f32.mrf.mxu3 }
 0x305   : > { %v1633_v20 = vadd.f32 %v1632_v1, %v1559_v58  ;;  %v1836_v61 = vpop.f32.mrf.mxu1 }
 0x307   : > { %v1731_v59 = vpop.f32.mrf.mxu0  ;;  %v1754_v43 = vadd.f32 %v1729_v40, %v1633_v20 }
 0x308   : > { %2927 = vmatmul.msk.bf16.gmra.mxu1 %vm1440_vm1, %v2205_v45 }
 0x309   : > { %v3708_v60 = vadd.f32 %v1836_v61, %v1754_v43  ;;  %v2304_v43 = vld [vmem:[#allocation3 + $0x3e] sm:$0xff] }
 0x30b   : > { %v1561_v62 = vpop.f32.mrf.mxu2 }
 0x30c   : > { %v1634_v7 = vpop.f32.mrf.mxu3 }
 0x30d   : > { %v1635_v56 = vadd.f32 %v1634_v7, %v1561_v62  ;;  %v1838_v21 = vpop.f32.mrf.mxu1 }
 0x30f   : > { %v1734_v12 = vpop.f32.mrf.mxu0  ;;  %v1755_v9 = vadd.f32 %v1731_v59, %v1635_v56  ;;  %v2303_v59 = vld [vmem:[#allocation3 + $0x36] sm:$0xff] }
 0x310   : > { %2865 = vmatmul.msk.bf16.gmra.mxu2 %vm1440_vm1, %v1885_v39  ;;  %v2311_v63 = vpack.c.bf16 %v2304_v43, %v2303_v59 }
 0x311   : > { %v3711_v48 = vadd.f32 %v1838_v21, %v1755_v9  ;;  %2886 = vmatmul.msk.bf16.gmra.mxu3 %vm1440_vm1, %v1992_v51 }
 0x312   : > { %2907 = vmatmul.msk.bf16.gmra.mxu0 %vm1440_vm1, %v2099_v14 }
 0x313   : > { %v1564_v5 = vpop.f32.mrf.mxu2 }
 0x314   : > { %v1637_v52 = vpop.f32.mrf.mxu3 }
 0x315   : > { %v1638_v28 = vadd.f32 %v1637_v52, %v1564_v5  ;;  %v1841_v6 = vpop.f32.mrf.mxu1  ;;  %v2306_v5 = vld [vmem:[#allocation3 + $0x4e] sm:$0xff] }
 0x317   : > { %v1736_v18 = vpop.f32.mrf.mxu0  ;;  %v1756_v38 = vadd.f32 %v1734_v12, %v1638_v28 }
 0x318   : > { %2928 = vmatmul.msk.bf16.gmra.mxu1 %vm1440_vm1, %v2206_v10 }
 0x319   : > { %v3716_v22 = vadd.f32 %v1841_v6, %v1756_v38  ;;  %v2312_v6 = vpack.c.bf16 %v2306_v5, %v2305_v0 }
 0x31b   : > { %v1566_v11 = vpop.f32.mrf.mxu2 }
 0x31c   : > { %v1639_v25 = vpop.f32.mrf.mxu3 }
 0x31d   : > { %v1640_v17 = vadd.f32 %v1639_v25, %v1566_v11  ;;  %v1843_v29 = vpop.f32.mrf.mxu1 }
 0x31f   : > { %v1739_v32 = vpop.f32.mrf.mxu0  ;;  %v1757_v2 = vadd.f32 %v1736_v18, %v1640_v17  ;;  %v2308_v17 = vld [vmem:[#allocation3 + $0x5e] sm:$0xff] }
 0x320   : > { %2945 = vmatmul.msk.bf16.vlgmr.msrb.gmra.mxu2 %vm1440_vm1, %v2309_v35  ;;  %v2313_v31 = vpack.c.bf16 %v2308_v17, %v2307_v4 }
 0x321   : > { %v3719_v34 = vadd.f32 %v1843_v29, %v1757_v2 }
 0x323   : > { %v1569_v24 = vpop.f32.mrf.mxu2 }
 0x324   : > { %v1642_v27 = vpop.f32.mrf.mxu3 }
 0x325   : > { %v1643_v44 = vadd.f32 %v1642_v27, %v1569_v24  ;;  %v1846_v42 = vpop.f32.mrf.mxu1 }
 0x327   : > { %v1741_v30 = vpop.f32.mrf.mxu0  ;;  %v1758_v46 = vadd.f32 %v1739_v32, %v1643_v44 }
 0x329   : > { %v1865_v54 = vadd.f32 %v1846_v42, %v1758_v46 }
 0x32b   : > { %v1571_v33 = vpop.f32.mrf.mxu2 }
 0x32c   : > { %v1644_v47 = vpop.f32.mrf.mxu3 }
 0x32d   : > { %v1645_v41 = vadd.f32 %v1644_v47, %v1571_v33  ;;  %v1848_v50 = vpop.f32.mrf.mxu1 }
 0x32f   : > { %v1744_v3 = vpop.f32.mrf.mxu0  ;;  %v1759_v37 = vadd.f32 %v1741_v30, %v1645_v41 }
 0x330   : > { %2946 = vmatmul.msk.bf16.gmra.mxu2 %vm1440_vm1, %v2310_v26 }
 0x331   : > { %v1866_v40 = vadd.f32 %v1848_v50, %v1759_v37 }
 0x333   : > { %v1574_v57 = vpop.f32.mrf.mxu2 }
 0x334   : > { %v1647_v53 = vpop.f32.mrf.mxu3 }
 0x335   : > { %v1648_v15 = vadd.f32 %v1647_v53, %v1574_v57  ;;  %v1851_v58 = vpop.f32.mrf.mxu1 }
 0x337   : > { %v1760_v1 = vadd.f32 %v1744_v3, %v1648_v15  ;;  %v1746_v49 = vpop.f32.mrf.mxu0 }
 0x339   : > { %v1867_v20 = vadd.f32 %v1851_v58, %v1760_v1 }
 0x33b   : > { %v1576_v61 = vpop.f32.mrf.mxu2 }
 0x33c   : > { %v1649_v23 = vpop.f32.mrf.mxu3 }
 0x33d   : > { %v1650_v45 = vadd.f32 %v1649_v23, %v1576_v61  ;;  %v1853_v62 = vpop.f32.mrf.mxu1 }
 0x33f   : > { %v1761_v7 = vadd.f32 %v1746_v49, %v1650_v45  ;;  %v1749_v55 = vpop.f32.mrf.mxu0 }
 0x340   : > { %2947 = vmatmul.msk.bf16.gmra.mxu2 %vm1440_vm1, %v2311_v63  ;;  %v3743_v63 = vld [vmem:[%s3829_s10] ss:$0 sm:$0xff] }
 0x341   : > { %v1868_v36 = vadd.f32 %v1853_v62, %v1761_v7 }
 0x343   : > { %v1579_v56 = vpop.f32.mrf.mxu2 }
 0x344   : > { %v1652_v13 = vpop.f32.mrf.mxu3 }
 0x345   : > { %v1653_v21 = vadd.f32 %v1652_v13, %v1579_v56  ;;  %v1856_v12 = vpop.f32.mrf.mxu1 }
 0x347   : > { %v1762_v9 = vadd.f32 %v1749_v55, %v1653_v21  ;;  %v1751_v16 = vpop.f32.mrf.mxu0 }
 0x349   : > { %v1869_v39 = vadd.f32 %v1856_v12, %v1762_v9 }
 0x34b   : > { %v1581_v51 = vpop.f32.mrf.mxu2 }
 0x34c   : > { %v1654_v14 = vpop.f32.mrf.mxu3 }
 0x34d   : > { %v1655_v52 = vadd.f32 %v1654_v14, %v1581_v51  ;;  %v1858_v18 = vpop.f32.mrf.mxu1 }
 0x34f   : > { %v1763_v28 = vadd.f32 %v1751_v16, %v1655_v52  ;;  %v2157_v47 = vpop.f32.mrf.mxu0 }
 0x350   : > { %2948 = vmatmul.msk.bf16.gmra.mxu2 %vm1440_vm1, %v2312_v6 }
 0x351   : > { %v1870_v38 = vadd.f32 %v1858_v18, %v1763_v28 }
 0x353   : > { %v1943_v10 = vpop.f32.mrf.mxu2 }
 0x354   : > { %v1968_v11 = vadd.f32 %v1943_v10, %v3708_v60  ;;  %v2050_v33 = vpop.f32.mrf.mxu3 }
 0x355   : > { %v2264_v41 = vpop.f32.mrf.mxu1 }
 0x357   : > { %v2159_v3 = vpop.f32.mrf.mxu0 }
 0x35b   : > { %v1945_v25 = vpop.f32.mrf.mxu2 }
 0x35c   : > { %v1969_v29 = vadd.f32 %v1945_v25, %v3711_v48  ;;  %v2052_v50 = vpop.f32.mrf.mxu3 }
 0x35e   : > { %v2076_v57 = vadd.f32 %v2052_v50, %v1969_v29 }
 0x360   : > { %2949 = vmatmul.msk.bf16.gmra.mxu2 %vm1440_vm1, %v2313_v31  ;;  %v2183_v1 = vadd.f32 %v2159_v3, %v2076_v57 }
 0x363   : > { %v1948_v32 = vpop.f32.mrf.mxu2 }
 0x364   : > { %v1970_v2 = vadd.f32 %v1948_v32, %v3716_v22  ;;  %v2055_v37 = vpop.f32.mrf.mxu3 }
 0x366   : > { %v2077_v23 = vadd.f32 %v2055_v37, %v1970_v2 }
 0x36b   : > { %v1950_v35 = vpop.f32.mrf.mxu2 }
 0x36c   : > { %v1971_v24 = vadd.f32 %v1950_v35, %v3719_v34  ;;  %v2266_v34 = vpop.f32.mrf.mxu1  ;;  %v2057_v58 = vpop.f32.mrf.mxu3 }
 0x36d   : > { %v2290_v61 = vadd.f32 %v2266_v34, %v2183_v1 }
 0x36e   : > { %v2078_v21 = vadd.f32 %v2057_v58, %v1971_v24 }
 0x373   : > { %v1953_v27 = vpop.f32.mrf.mxu2 }
 0x374   : > { %v1972_v44 = vadd.f32 %v1953_v27, %v1865_v54  ;;  %v2269_v53 = vpop.f32.mrf.mxu1 }
 0x37b   : > { %v1955_v42 = vpop.f32.mrf.mxu2 }
 0x37c   : > { %v3730_v30 = vadd.f32 %v1955_v42, %v1866_v40  ;;  %v2162_v40 = vpop.f32.mrf.mxu0  ;;  %v2271_v45 = vpop.f32.mrf.mxu1 }
 0x37d   : > { %v2184_v7 = vadd.f32 %v2162_v40, %v2077_v23 }
 0x37f   : > { %v2291_v13 = vadd.f32 %v2269_v53, %v2184_v7 }
 0x383   : > { %v1958_v60 = vpop.f32.mrf.mxu2 }
 0x384   : > { %v3732_v46 = vadd.f32 %v1958_v60, %v1867_v20  ;;  %v2164_v49 = vpop.f32.mrf.mxu0  ;;  %v2075_v20 = vadd.f32 %v2050_v33, %v1968_v11  ;;  %v2274_v16 = vpop.f32.mrf.mxu1 }
 0x385   : > { %v2185_v5 = vadd.f32 %v2164_v49, %v2078_v21 }
 0x386   : > { %v2182_v62 = vadd.f32 %v2157_v47, %v2075_v20 }
 0x388   : > { %v2289_v56 = vadd.f32 %v2264_v41, %v2182_v62 }
 0x38b   : > { %v1960_v48 = vpop.f32.mrf.mxu2 }
 0x38c   : > { %v3734_v8 = vadd.f32 %v1960_v48, %v1868_v36  ;;  %v2060_v36 = vpop.f32.mrf.mxu3  ;;  %v2167_v12 = vpop.f32.mrf.mxu0 }
 0x38d   : > { %v2079_v10 = vadd.f32 %v2060_v36, %v1972_v44  ;;  %v2276_v33 = vpop.f32.mrf.mxu1 }
 0x38f   : > { %v2186_v2 = vadd.f32 %v2167_v12, %v2079_v10 }
 0x391   : > { %v2293_v44 = vadd.f32 %v2274_v16, %v2186_v2 }
 0x393   : > { %v1963_v19 = vpop.f32.mrf.mxu2 }
 0x394   : > { %v3736_v22 = vadd.f32 %v1963_v19, %v1869_v39  ;;  %v2062_v18 = vpop.f32.mrf.mxu3  ;;  %v2169_v32 = vpop.f32.mrf.mxu0 }
 0x395   : > { %v2279_v20 = vpop.f32.mrf.mxu1 }
 0x39b   : > { %v1965_v54 = vpop.f32.mrf.mxu2 }
 0x39c   : > { %v3738_v26 = vadd.f32 %v1965_v54, %v1870_v38  ;;  %v2292_v38 = vadd.f32 %v2271_v45, %v2185_v5  ;;  %v2065_v41 = vpop.f32.mrf.mxu3 }
 0x39d   : > { %v2081_v1 = vadd.f32 %v2065_v41, %v3732_v46 }
 0x3a3   : > { %v2371_v15 = vpop.f32.mrf.mxu2 }
 0x3a4   : > { %v2396_v39 = vadd.f32 %v2371_v15, %v2289_v56  ;;  %v2172_v15 = vpop.f32.mrf.mxu0 }
 0x3a6   : > { %v2410_v0 = vadd.f32 %v3743_v63, %v2396_v39 }
 0x3a8   : > { %v2420_v4 = vmax.f32 %v2410_v0, 0.0 }
 0x3aa   : > { %v2430_v27 = vpack.c.bf16 %v2420_v4, %v2420_v4 }
 0x3ab   : > { %v2373_v59 = vpop.f32.mrf.mxu2 }
 0x3ac   : > { %v2397_v43 = vadd.f32 %v2373_v59, %v2290_v61  ;;  %v2067_v59 = vpop.f32.mrf.mxu3  ;;  %v2174_v36 = vpop.f32.mrf.mxu0 }
 0x3ae   : > { %v2411_v55 = vadd.f32 %v3743_v63, %v2397_v43  ;;  %v2188_v43 = vadd.f32 %v2172_v15, %v2081_v1 }
 0x3b0   : > { %v2421_v51 = vmax.f32 %v2411_v55, 0.0  ;;  %v2080_v55 = vadd.f32 %v2062_v18, %v3730_v30  ;;  %v2295_v56 = vadd.f32 %v2279_v20, %v2188_v43 }
 0x3b2   : > { %v2431_v28 = vpack.c.bf16 %v2421_v51, %v2421_v51  ;;  %v2281_v51 = vpop.f32.mrf.mxu1 }
 0x3b3   : > { %v2376_v9 = vpop.f32.mrf.mxu2 }
 0x3b4   : > { %v2398_v14 = vadd.f32 %v2376_v9, %v2291_v13  ;;  %v2442_v17 = vunpack.c.l.b16 %v2431_v28  ;;  %v2082_v13 = vadd.f32 %v2067_v59, %v3734_v8  ;;  %v2070_v0 = vpop.f32.mrf.mxu3  ;;  %v2177_v18 = vpop.f32.mrf.mxu0 }
 0x3b6   : > { %v2412_v52 = vadd.f32 %v3743_v63, %v2398_v14  ;;  %v2189_v16 = vadd.f32 %v2174_v36, %v2082_v13 }
 0x3b8   : > { %v2422_v6 = vmax.f32 %v2412_v52, 0.0  ;;  %v2187_v52 = vadd.f32 %v2169_v32, %v2080_v55  ;;  %v2296_v8 = vadd.f32 %v2281_v51, %v2189_v16 }
 0x3ba   : > { %v2432_v11 = vpack.c.bf16 %v2422_v6, %v2422_v6  ;;  %v2294_v28 = vadd.f32 %v2276_v33, %v2187_v52  ;;  %v2083_v6 = vadd.f32 %v2070_v0, %v3736_v22 }
 0x3bb   : > { %v2378_v25 = vpop.f32.mrf.mxu2 }
 0x3bc   : > { %v2443_v29 = vunpack.c.l.b16 %v2432_v11  ;;  %v2399_v31 = vadd.f32 %v2378_v25, %v2292_v38  ;;  %v2190_v4 = vadd.f32 %v2177_v18, %v2083_v6 }
 0x3be   : > { %v2444_v35 = vpack.c.b16 %v2443_v29, %v2442_v17  ;;  %v2413_v24 = vadd.f32 %v3743_v63, %v2399_v31 }
 0x3c0   : > { %v2445_v42 = vrot.slane %v2444_v35, 5  ;;  %v2423_v60 = vmax.f32 %v2413_v24, 0.0  ;;  %v2072_v35 = vpop.f32.mrf.mxu3 }
 0x3c2   : > { %v2470_v47 = vsel %vm1313_vm3, %v2430_v27, %v2445_v42  ;;  %v2433_v48 = vpack.c.bf16 %v2423_v60, %v2423_v60  ;;  %v2084_v27 = vadd.f32 %v2072_v35, %v3738_v26 }
 0x3c3   : > { %v2484_v50 = vunpack.c.l.b16 %v2470_v47  ;;  %v2485_v19 = vunpack.c.h.b16 %v2470_v47  ;;  %v2381_v3 = vpop.f32.mrf.mxu2 }
 0x3c4   : > { %v2447_v34 = vunpack.c.l.b16 %v2433_v48  ;;  %v2400_v37 = vadd.f32 %v2381_v3, %v2293_v44  ;;  %v2179_v48 = vpop.f32.mrf.mxu0 }
 0x3c5   : > { %v2492_v54 = vpack.c.b16 %v2484_v50, %v2484_v50  ;;  %v2493_v40 = vpack.c.b16 %v2485_v19, %v2485_v19  ;;  %v2191_v41 = vadd.f32 %v2179_v48, %v2084_v27 }
 0x3c6   : > { %v2448_v57 = vpack.c.b16 %v2447_v34, %v2443_v29  ;;  %v2414_v53 = vadd.f32 %v3743_v63, %v2400_v37  ;;  %v2284_v29 = vpop.f32.mrf.mxu1 }
 0x3c7   : > { %2509 = vst.msk [vmem:[%s3754_s12] sm:$0xf] %vm2508_vm4, %v2492_v54  ;;  %v2297_v24 = vadd.f32 %v2284_v29, %v2190_v4 }
 0x3c8   : > { %2510 = vst.msk [vmem:[%s3754_s12 + $0x4] sm:$0xf] %vm2508_vm4, %v2493_v40  ;;  %v2424_v58 = vmax.f32 %v2414_v53, 0.0  ;;  %v2449_v62 = vrot.slane %v2448_v57, 2 }
 0x3ca   : > { %v2434_v49 = vpack.c.bf16 %v2424_v58, %v2424_v58 }
 0x3cb   : > { %v2383_v61 = vpop.f32.mrf.mxu2 }
 0x3cc   : > { %v2451_v23 = vunpack.c.l.b16 %v2434_v49  ;;  %v2401_v10 = vadd.f32 %v2383_v61, %v2294_v28 }
 0x3ce   : > { %v2452_v45 = vpack.c.b16 %v2451_v23, %v2447_v34  ;;  %v2415_v31 = vadd.f32 %v3743_v63, %v2401_v10  ;;  %v2286_v54 = vpop.f32.mrf.mxu1 }
 0x3cf   : > { %v2298_v40 = vadd.f32 %v2286_v54, %v2191_v41 }
 0x3d0   : > { %v2453_v7 = vrot.slane %v2452_v45, 7  ;;  %v2425_v22 = vmax.f32 %v2415_v31, 0.0 }
 0x3d2   : > { %v2473_v21 = vsel %vm1313_vm3, %v2449_v62, %v2453_v7  ;;  %v2435_v3 = vpack.c.bf16 %v2425_v22, %v2425_v22 }
 0x3d3   : > { %v2486_v46 = vunpack.c.l.b16 %v2473_v21  ;;  %v2487_v12 = vunpack.c.h.b16 %v2473_v21  ;;  %v2386_v9 = vpop.f32.mrf.mxu2 }
 0x3d4   : > { %v2402_v39 = vadd.f32 %v2386_v9, %v2295_v56 }
 0x3d5   : > { %v2494_v14 = vpack.c.b16 %v2486_v46, %v2486_v46  ;;  %v2495_v5 = vpack.c.b16 %v2487_v12, %v2487_v12 }
 0x3d6   : > { %v2416_v30 = vadd.f32 %v3743_v63, %v2402_v39 }
 0x3d7   : > { %2511 = vst.msk [vmem:[%s3754_s12 + $0x8] sm:$0xf] %vm2508_vm4, %v2494_v14 }
 0x3d8   : > { %2512 = vst.msk [vmem:[%s3754_s12 + $0xc] sm:$0xf] %vm2508_vm4, %v2495_v5  ;;  %v2426_v11 = vmax.f32 %v2416_v30, 0.0 }
 0x3da   : > { %v2436_v32 = vpack.c.bf16 %v2426_v11, %v2426_v11 }
 0x3db   : > { %v2388_v38 = vpop.f32.mrf.mxu2 }
 0x3dc   : > { %v2403_v25 = vadd.f32 %v2388_v38, %v2296_v8  ;;  %v2456_v33 = vunpack.c.l.b16 %v2436_v32 }
 0x3de   : > { %v2417_v17 = vadd.f32 %v3743_v63, %v2403_v25 }
 0x3e0   : > { %v2427_v2 = vmax.f32 %v2417_v17, 0.0 }
 0x3e2   : > { %v2437_v42 = vpack.c.bf16 %v2427_v2, %v2427_v2 }
 0x3e3   : > { %v2391_v60 = vpop.f32.mrf.mxu2 }
 0x3e4   : > { %v2457_v44 = vunpack.c.l.b16 %v2437_v42  ;;  %v2404_v47 = vadd.f32 %v2391_v60, %v2297_v24 }
 0x3e6   : > { %v2458_v50 = vpack.c.b16 %v2457_v44, %v2456_v33  ;;  %v2418_v19 = vadd.f32 %v3743_v63, %v2404_v47 }
 0x3e8   : > { %v2459_v34 = vrot.slane %v2458_v50, 5  ;;  %v2428_v37 = vmax.f32 %v2418_v19, 0.0 }
 0x3ea   : > { %v2476_v26 = vsel %vm1313_vm3, %v2435_v3, %v2459_v34  ;;  %v2438_v57 = vpack.c.bf16 %v2428_v37, %v2428_v37 }
 0x3eb   : > { %v2488_v53 = vunpack.c.l.b16 %v2476_v26  ;;  %v2489_v15 = vunpack.c.h.b16 %v2476_v26  ;;  %v2393_v58 = vpop.f32.mrf.mxu2 }
 0x3ec   : > { %v2461_v1 = vunpack.c.l.b16 %v2438_v57  ;;  %v2405_v49 = vadd.f32 %v2393_v58, %v2298_v40 }
 0x3ed   : > { %v2496_v20 = vpack.c.b16 %v2488_v53, %v2488_v53  ;;  %v2497_v61 = vpack.c.b16 %v2489_v15, %v2489_v15 }
 0x3ee   : > { %v2462_v23 = vpack.c.b16 %v2461_v1, %v2457_v44  ;;  %v2419_v59 = vadd.f32 %v3743_v63, %v2405_v49 }
 0x3ef   : > { %2513 = vst.msk [vmem:[%s3754_s12 + $0x10] sm:$0xf] %vm2508_vm4, %v2496_v20 }
 0x3f0   : > { %2514 = vst.msk [vmem:[%s3754_s12 + $0x14] sm:$0xf] %vm2508_vm4, %v2497_v61  ;;  %v2429_v43 = vmax.f32 %v2419_v59, 0.0  ;;  %v2463_v36 = vrot.slane %v2462_v23, 2 }
 0x3f2   : > { %v2439_v45 = vpack.c.bf16 %v2429_v43, %v2429_v43 }
 0x3f4   : > { %v2465_v62 = vunpack.c.l.b16 %v2439_v45 }
 0x3f6   : > { %v2466_v7 = vpack.c.b16 %v2465_v62, %v2461_v1 }
 0x3f8   : > { %v2467_v55 = vrot.slane %v2466_v7, 7 }
 0x3fa   : > { %v2479_v63 = vsel %vm1313_vm3, %v2463_v36, %v2467_v55 }
 0x3fb   : > { %v2490_v56 = vunpack.c.l.b16 %v2479_v63  ;;  %v2491_v13 = vunpack.c.h.b16 %v2479_v63 }
 0x3fd   : > { %v2498_v21 = vpack.c.b16 %v2490_v56, %v2490_v56  ;;  %v2499_v46 = vpack.c.b16 %v2491_v13, %v2491_v13 }
 0x3ff   : > { %2515 = vst.msk [vmem:[%s3754_s12 + $0x18] sm:$0xf] %vm2508_vm4, %v2498_v21 }
 0x400   : > { %2516 = vst.msk [vmem:[%s3754_s12 + $0x1c] sm:$0xf] %vm2508_vm4, %v2499_v46 }
 0x401   : > { %3130 = shalt.err (!%p3127_p8)
}
 0x402   : > { %s3175_s29 = smov 64   ;;  %s3176_s12 = smov 4  }
 0x403   : > { %3017 = dma.vmem_to_hbm [thread:$0]  (%p3275_p5), %s2531_s22, 512, %s2533_s24, %s2518_s21, %s3175_s29, %s3175_s29, %s3176_s12  }
 0x404 PF: > { %p3029_p9 = scmp.ge.s32.totalorder %s3169_s20, 2  ;;  %s2547_s13 = sand.u32 1, %s3157_s17  }
 0x405   : > { %s2548_s0 = scalar_lea.sflag [#allocation6], %s2547_s13 }
 0x406   : > { %p3024_p10 = pnand %p3029_p9, %p3279_p6 }
 0x408   : > { %p3025_p11 = pneg %p3024_p10 }
 0x40a   : > { %3152 = dma.done.wait (%p3025_p11), %s2548_s0, 512  }
 0x40b   : > { %3154 = vsyncadd (%p3025_p11), %s2548_s0, 4294966784  ;;  %p22_p12 = scmp.ge.s32.totalorder %s3262_s23, 4   ;;  %s3835_s17 = smov %s3161_s18 }
 0x40c   : > { %s3836_s18 = smov %s3165_s19  ;;  %s3837_s19 = smov %s3273_s26 }
 0x40d   : > { %s3838_s20 = smov %s3262_s23  ;;  %24 = sbr.rel (!%p22_p12) target bundleno = 6 (0x6), region = 120 }
 0x412   :  { %2554 = vsyncpa [#allocation5], 1 }
 0x413   :  { %2556 = vsyncpa [#allocation5 + $0x1], 1 }
 0x414   :  { %2557 = vsyncpa [#allocation6], 1 }
 0x415   :  { %2559 = vsyncpa [#allocation6 + $0x1], 1 }

</bundles_post_ra>
